<compile_context>
chip_gen: v5e
topology: v5e:2x2
jax: 0.10.0
libtpu: 0.0.40
codegen_flags: <defaults>
</compile_context>

<pallas_src>
import math
from functools import partial

import numpy as np
import jax
import jax.numpy as jnp
from jax import lax
from jax.experimental import pallas as pl
from jax.experimental.pallas import tpu as pltpu


def _round_up(x, m):
    return ((x + m - 1) // m) * m


# ---------------------------------------------------------------------------
# Fused kernel: rank-1 GraphConv + edge-tiled scatter + segment softmax + pool
# ---------------------------------------------------------------------------
def _gap_kernel(x_ref, w_ref, b_ref, src_ref, dst_ref, brow_ref, bcol_ref,
                o_ref, proj_ref, agg_ref):
    f32 = jnp.float32
    k = pl.program_id(0)
    n_pad = x_ref.shape[0]
    te = src_ref.shape[0]
    b_pad = o_ref.shape[0]

    # ---- once: rank-1 projections (out_channels == 1) + accumulator init ----
    @pl.when(k == 0)
    def _init():
        # proj[:, 0] = x @ w_rel, proj[:, 1] = x @ w_root (rest of lanes are zero)
        proj_ref[...] = jnp.dot(x_ref[...], w_ref[...], preferred_element_type=f32)
        agg_ref[...] = jnp.zeros_like(agg_ref)

    # ---- per edge tile: gather x_rel[src[e]], scatter-add to dst[e] ----------
    x_rel_col = proj_ref[:, 0:1]                                        # (N, 1)
    # gather_t[e, n] = [src[e] == n]  (src tile is a (TE,1) column)
    gather_t = (src_ref[...] ==
                lax.broadcasted_iota(jnp.int32, (te, n_pad), 1)).astype(f32)
    edge_vals = jnp.dot(gather_t, x_rel_col, preferred_element_type=f32)  # (TE, 1)
    # scatter_t[n, e] = [dst[e] == n]  (dst tile is a lane-dense (1,TE) row)
    scatter_t = (dst_ref[...] ==
                 lax.broadcasted_iota(jnp.int32, (n_pad, te), 0)).astype(f32)
    agg_ref[...] += jnp.dot(scatter_t, edge_vals, preferred_element_type=f32)  # (N, 1)

    # ---- last tile: segment softmax + attention-weighted add-pool ------------
    @pl.when(k == pl.num_programs(0) - 1)
    def _finalize():
        x = x_ref[...]                                                  # (N, H)
        x_root_col = proj_ref[:, 1:2]                                   # (N, 1)
        xc = agg_ref[...] + x_root_col + b_ref[...]                     # (N, 1)

        # per-graph max, gathered back per node -> exp exactly once per node
        seg_nb = (bcol_ref[...] ==
                  lax.broadcasted_iota(jnp.int32, (n_pad, b_pad), 1))   # (N, B) bool
        masked = jnp.where(seg_nb, xc, jnp.float32(-1e30))              # (N, B)
        seg_max = jnp.max(masked, axis=0, keepdims=True)                # (1, B)
        shift = jnp.sum(jnp.where(seg_nb, seg_max, 0.0),
                        axis=1, keepdims=True)                          # (N, 1)
        ex = jnp.exp(xc - shift)                                        # (N, 1)  EUP

        # pooled_raw[b, :] = sum_{n: batch[n]==b} ex[n] * x[n, :]   (MXU)
        seg_bn = (lax.broadcasted_iota(jnp.int32, (b_pad, n_pad), 0) ==
                  brow_ref[...]).astype(f32)                            # (B, N)
        seg_sum = jnp.dot(seg_bn, ex, preferred_element_type=f32)       # (B, 1)
        pooled = jnp.dot(seg_bn, x * ex, preferred_element_type=f32)    # (B, H)

        # normalize after the matmul: B reciprocals + B*H multiplies
        o_ref[...] = pooled * pl.reciprocal(seg_sum + 1e-16, approx=True)


# ---------------------------------------------------------------------------
# Wrapper: padding, BlockSpecs, grid over edge tiles
# ---------------------------------------------------------------------------
@partial(jax.jit, static_argnames=("num_graphs", "edge_tile"))
def global_attention_pool(x, edge_index, batch, w_rel, b_rel, w_root, *,
                          num_graphs, edge_tile=512):
    """Fused GlobalAttentionPool forward.  x: (N,H), edge_index: (2,E), batch: (N,)."""
    assert edge_tile % 128 == 0, "edge_tile must be a multiple of 128"
    x = x.astype(jnp.float32)
    N, H = x.shape
    E = edge_index.shape[1]

    n_pad = max(_round_up(N, 8), 8)
    e_pad = max(_round_up(E, edge_tile), edge_tile)
    b_pad = max(_round_up(num_graphs, 8), 8)
    num_tiles = e_pad // edge_tile

    # pad nodes with zero features / batch=-1, edges with src=dst=-1 (no-ops)
    x_p = jnp.pad(x, ((0, n_pad - N), (0, 0)))
    src = jnp.pad(edge_index[0].astype(jnp.int32), (0, e_pad - E), constant_values=-1)
    dst = jnp.pad(edge_index[1].astype(jnp.int32), (0, e_pad - E), constant_values=-1)
    bat = jnp.pad(batch.astype(jnp.int32), (0, n_pad - N), constant_values=-1)

    src_col = src.reshape(e_pad, 1)        # sublane-indexed per tile
    dst_row = dst.reshape(1, e_pad)        # lane-dense per tile
    batch_row = bat.reshape(1, n_pad)
    batch_col = bat.reshape(n_pad, 1)

    # stacked rank-1 weights, lane-padded for an aligned MXU pass
    w = jnp.zeros((H, 128), jnp.float32)
    w = w.at[:, 0].set(w_rel.astype(jnp.float32))
    w = w.at[:, 1].set(w_root.astype(jnp.float32))
    bias = jnp.asarray(b_rel, jnp.float32).reshape(1, 1)

    # VMEM budget derived from the tiled working set (cap leaves v7x headroom)
    vmem_need = (n_pad * H * 4                      # resident x block
                 + 2 * n_pad * 128 * 4              # proj + agg scratch (lane-padded)
                 + 2 * n_pad * edge_tile * 4        # gather/scatter masks
                 + 2 * (edge_tile * 128 * 4 + 8 * edge_tile * 4)   # index tiles (2-buf)
                 + b_pad * (H + n_pad) * 4          # output + seg mask
                 + (2 << 20))                       # slack
    vmem_limit = int(min(max(vmem_need, 8 << 20), 48 << 20))

    grid_spec = pltpu.PrefetchScalarGridSpec(
        num_scalar_prefetch=0,
        grid=(num_tiles,),
        in_specs=[
            pl.BlockSpec((n_pad, H), lambda k: (0, 0)),        # x (VMEM-resident)
            pl.BlockSpec((H, 128), lambda k: (0, 0)),          # [w_rel | w_root]
            pl.BlockSpec((1, 1), lambda k: (0, 0)),            # bias
            pl.BlockSpec((edge_tile, 1), lambda k: (k, 0)),    # src tile
            pl.BlockSpec((1, edge_tile), lambda k: (0, k)),    # dst tile
            pl.BlockSpec((1, n_pad), lambda k: (0, 0)),        # batch (row)
            pl.BlockSpec((n_pad, 1), lambda k: (0, 0)),        # batch (column)
        ],
        out_specs=pl.BlockSpec((b_pad, H), lambda k: (0, 0)),
        scratch_shapes=[
            pltpu.VMEM((n_pad, 128), jnp.float32),   # rank-1 projections
            pltpu.VMEM((n_pad, 1), jnp.float32),     # neighbor-sum accumulator
        ],
    )

    out = pl.pallas_call(
        _gap_kernel,
        out_shape=jax.ShapeDtypeStruct((b_pad, H), jnp.float32),
        grid_spec=grid_spec,
        compiler_params=pltpu.CompilerParams(
            dimension_semantics=("arbitrary",),
            vmem_limit_bytes=vmem_limit,
        ),
    )(x_p, w, bias, src_col, dst_row, batch_row, batch_col)
    return out[:num_graphs]


# ---------------------------------------------------------------------------
# Pure-JAX reference (PyG semantics) for correctness checking
# ---------------------------------------------------------------------------
def gap_reference(x, edge_index, batch, w_rel, b_rel, w_root, num_graphs):
    src, dst = edge_index[0], edge_index[1]
    agg = jax.ops.segment_sum(x[src], dst, num_segments=x.shape[0])
    x_conv = (jnp.sum(agg * w_rel[None, :] + x * w_root[None, :], axis=1, keepdims=True)
              + b_rel)                                                    # (N, 1)
    seg_max = jax.ops.segment_max(x_conv, batch, num_segments=num_graphs)
    ex = jnp.exp(x_conv - seg_max[batch])
    denom = jax.ops.segment_sum(ex, batch, num_segments=num_graphs) + 1e-16
    scores = ex / denom[batch]
    return jax.ops.segment_sum(x * scores, batch, num_segments=num_graphs)


# ---------------------------------------------------------------------------
# Deterministic small example (2 graphs, N=128, E=256 -> two edge tiles)
# ---------------------------------------------------------------------------
if __name__ == "__main__":
    HID = 128                      # hidden_dim (lane-dense output)
    node_counts = [60, 68]         # 2 graphs; N=128, E=256 -> exercises 2 grid steps
    B = len(node_counts)

    # bidirectional ring graphs (PyG-style batched edge_index / batch vector)
    srcs, dsts, nbatch = [], [], []
    off = 0
    for g, n in enumerate(node_counts):
        for i in range(n):
            u, v = off + i, off + (i + 1) % n
            srcs += [u, v]
            dsts += [v, u]
        nbatch += [g] * n
        off += n
    N = off
    edge_index = jnp.asarray(np.array([srcs, dsts], dtype=np.int32))
    batch = jnp.asarray(np.array(nbatch, dtype=np.int32))

    key = jax.random.PRNGKey(0)
    kx, kr, ko = jax.random.split(key, 3)
    x = jax.random.normal(kx, (N, HID), jnp.float32)
    # GraphConv(HID, 1) parameters: lin_rel weight/bias + lin_root weight
    w_rel = jax.random.normal(kr, (HID,), jnp.float32) / math.sqrt(HID)
    w_root = jax.random.normal(ko, (HID,), jnp.float32) / math.sqrt(HID)
    b_rel = jnp.float32(0.01)

    gx = global_attention_pool(x, edge_index, batch, w_rel, b_rel, w_root,
                               num_graphs=B, edge_tile=128)
    jax.block_until_ready(gx)

    ref = gap_reference(x, edge_index, batch, w_rel, b_rel, w_root, B)
    assert gx.shape == (B, HID)
    assert bool(jnp.all(jnp.isfinite(gx)))
    assert bool(jnp.allclose(gx, ref, rtol=2e-3, atol=2e-3)), float(jnp.max(jnp.abs(gx - ref)))
    print("KERNEL_OK")
</pallas_src>

<mosaic_0001>
module attributes {stable_mosaic.version = 11 : i64} {
  func.func @_gap_kernel(%arg0: i32, %arg1: memref<128x128xf32, #tpu.memory_space<vmem>>, %arg2: memref<128x128xf32, #tpu.memory_space<vmem>>, %arg3: memref<1x1xf32, #tpu.memory_space<vmem>>, %arg4: memref<128x1xi32, #tpu.memory_space<vmem>>, %arg5: memref<1x128xi32, #tpu.memory_space<vmem>>, %arg6: memref<1x128xi32, #tpu.memory_space<vmem>>, %arg7: memref<128x1xi32, #tpu.memory_space<vmem>>, %arg8: memref<8x128xf32, #tpu.memory_space<vmem>>, %arg9: memref<128x128xf32, #tpu.memory_space<vmem>>, %arg10: memref<128x1xf32, #tpu.memory_space<vmem>>) attributes {dimension_semantics = [#tpu.dimension_semantics<arbitrary>], iteration_bounds = array<i64: 2>, scalar_prefetch = 0 : i64, scratch_operands = 2 : i64, tpu.core_type = #tpu.core_type<tc>, window_params = [{pipeline_mode = #tpu.pipeline_mode<synchronous>, transform_indices = @transform_0, window_bounds = array<i64: 128, 128>}, {pipeline_mode = #tpu.pipeline_mode<synchronous>, transform_indices = @transform_1, window_bounds = array<i64: 128, 128>}, {pipeline_mode = #tpu.pipeline_mode<synchronous>, transform_indices = @transform_2, window_bounds = array<i64: 1, 1>}, {transform_indices = @transform_3, window_bounds = array<i64: 128, 1>}, {transform_indices = @transform_4, window_bounds = array<i64: 1, 128>}, {pipeline_mode = #tpu.pipeline_mode<synchronous>, transform_indices = @transform_5, window_bounds = array<i64: 1, 128>}, {pipeline_mode = #tpu.pipeline_mode<synchronous>, transform_indices = @transform_6, window_bounds = array<i64: 128, 1>}, {pipeline_mode = #tpu.pipeline_mode<synchronous>, transform_indices = @transform_7, window_bounds = array<i64: 8, 128>}]} {
    %c0_i32 = arith.constant 0 : i32
    %0 = arith.cmpi eq, %arg0, %c0_i32 : i32
    %1 = arith.extui %0 : i1 to i32
    %c0_i32_0 = arith.constant 0 : i32
    %2 = arith.cmpi ne, %1, %c0_i32_0 : i32
    scf.if %2 {
      %c0_12 = arith.constant 0 : index
      %c0_13 = arith.constant 0 : index
      %24 = vector.load %arg1[%c0_12, %c0_13] : memref<128x128xf32, #tpu.memory_space<vmem>>, vector<128x128xf32>
      %c0_14 = arith.constant 0 : index
      %c0_15 = arith.constant 0 : index
      %25 = vector.load %arg2[%c0_14, %c0_15] : memref<128x128xf32, #tpu.memory_space<vmem>>, vector<128x128xf32>
      %cst_16 = arith.constant dense<0.000000e+00> : vector<128x128xf32>
      %26 = tpu.matmul %24, %25, %cst_16 {dimension_numbers = #tpu.dot_dimension_numbers<[1], [0], [0], [1], [0, 0, 1, 1], [], []>} : vector<128x128xf32>, vector<128x128xf32>, vector<128x128xf32> -> vector<128x128xf32>
      %c0_17 = arith.constant 0 : index
      %c0_18 = arith.constant 0 : index
      %27 = vector.load %arg9[%c0_17, %c0_18] : memref<128x128xf32, #tpu.memory_space<vmem>>, vector<128x128xf32>
      tpu.vector_store %arg9[%c0_17, %c0_18], %26 {strides = array<i32>} : memref<128x128xf32, #tpu.memory_space<vmem>>, vector<128x128xf32>,
      %cst_19 = arith.constant 0.000000e+00 : f32
      %28 = vector.broadcast %cst_19 : f32 to vector<128x1xf32>
      %c0_20 = arith.constant 0 : index
      %c0_21 = arith.constant 0 : index
      %29 = vector.load %arg10[%c0_20, %c0_21] : memref<128x1xf32, #tpu.memory_space<vmem>>, vector<128x1xf32>
      tpu.vector_store %arg10[%c0_20, %c0_21], %28 {strides = array<i32>} : memref<128x1xf32, #tpu.memory_space<vmem>>, vector<128x1xf32>,
    } else {
    }
    %c0 = arith.constant 0 : index
    %c0_1 = arith.constant 0 : index
    %3 = vector.load %arg9[%c0, %c0_1] : memref<128x128xf32, #tpu.memory_space<vmem>>, vector<128x1xf32>
    %c0_2 = arith.constant 0 : index
    %c0_3 = arith.constant 0 : index
    %4 = vector.load %arg4[%c0_2, %c0_3] : memref<128x1xi32, #tpu.memory_space<vmem>>, vector<128x1xi32>
    %5 = tpu.iota {dimensions = array<i32: 1>} : vector<128x128xi32>
    %6 = vector.broadcast %4 : vector<128x1xi32> to vector<128x128xi32>
    %7 = arith.cmpi eq, %6, %5 : vector<128x128xi32>
    %8 = arith.extui %7 : vector<128x128xi1> to vector<128x128xi32>
    %9 = arith.sitofp %8 : vector<128x128xi32> to vector<128x128xf32>
    %cst = arith.constant dense<0.000000e+00> : vector<128x1xf32>
    %10 = tpu.matmul %9, %3, %cst {dimension_numbers = #tpu.dot_dimension_numbers<[1], [0], [0], [1], [0, 0, 1, 1], [], []>} : vector<128x128xf32>, vector<128x1xf32>, vector<128x1xf32> -> vector<128x1xf32>
    %c0_4 = arith.constant 0 : index
    %c0_5 = arith.constant 0 : index
    %11 = vector.load %arg5[%c0_4, %c0_5] : memref<1x128xi32, #tpu.memory_space<vmem>>, vector<1x128xi32>
    %12 = tpu.iota {dimensions = array<i32: 0>} : vector<128x128xi32>
    %13 = vector.broadcast %11 : vector<1x128xi32> to vector<128x128xi32>
    %14 = arith.cmpi eq, %13, %12 : vector<128x128xi32>
    %15 = arith.extui %14 : vector<128x128xi1> to vector<128x128xi32>
    %16 = arith.sitofp %15 : vector<128x128xi32> to vector<128x128xf32>
    %c0_6 = arith.constant 0 : index
    %c0_7 = arith.constant 0 : index
    %17 = vector.load %arg10[%c0_6, %c0_7] : memref<128x1xf32, #tpu.memory_space<vmem>>, vector<128x1xf32>
    %cst_8 = arith.constant dense<0.000000e+00> : vector<128x1xf32>
    %18 = tpu.matmul %16, %10, %cst_8 {dimension_numbers = #tpu.dot_dimension_numbers<[1], [0], [0], [1], [0, 0, 1, 1], [], []>} : vector<128x128xf32>, vector<128x1xf32>, vector<128x1xf32> -> vector<128x1xf32>
    %19 = arith.addf %17, %18 : vector<128x1xf32>
    %c0_9 = arith.constant 0 : index
    %c0_10 = arith.constant 0 : index
    %20 = vector.load %arg10[%c0_9, %c0_10] : memref<128x1xf32, #tpu.memory_space<vmem>>, vector<128x1xf32>
    tpu.vector_store %arg10[%c0_9, %c0_10], %19 {strides = array<i32>} : memref<128x1xf32, #tpu.memory_space<vmem>>, vector<128x1xf32>,
    %c1_i32 = arith.constant 1 : i32
    %21 = arith.cmpi eq, %arg0, %c1_i32 : i32
    %22 = arith.extui %21 : i1 to i32
    %c0_i32_11 = arith.constant 0 : i32
    %23 = arith.cmpi ne, %22, %c0_i32_11 : i32
    scf.if %23 {
      %c0_12 = arith.constant 0 : index
      %c0_13 = arith.constant 0 : index
      %24 = vector.load %arg1[%c0_12, %c0_13] : memref<128x128xf32, #tpu.memory_space<vmem>>, vector<128x128xf32>
      %c0_14 = arith.constant 0 : index
      %c1 = arith.constant 1 : index
      %25 = vector.load %arg9[%c0_14, %c1] : memref<128x128xf32, #tpu.memory_space<vmem>>, vector<128x1xf32>
      %c0_15 = arith.constant 0 : index
      %c0_16 = arith.constant 0 : index
      %26 = vector.load %arg10[%c0_15, %c0_16] : memref<128x1xf32, #tpu.memory_space<vmem>>, vector<128x1xf32>
      %27 = arith.addf %26, %25 : vector<128x1xf32>
      %c0_17 = arith.constant 0 : index
      %c0_18 = arith.constant 0 : index
      %28 = vector.load %arg3[%c0_17, %c0_18] : memref<1x1xf32, #tpu.memory_space<vmem>>, vector<1x1xf32>
      %29 = vector.broadcast %28 : vector<1x1xf32> to vector<128x1xf32>
      %30 = arith.addf %27, %29 : vector<128x1xf32>
      %c0_19 = arith.constant 0 : index
      %c0_20 = arith.constant 0 : index
      %31 = vector.load %arg7[%c0_19, %c0_20] : memref<128x1xi32, #tpu.memory_space<vmem>>, vector<128x1xi32>
      %32 = tpu.iota {dimensions = array<i32: 1>} : vector<128x8xi32>
      %33 = vector.broadcast %31 : vector<128x1xi32> to vector<128x8xi32>
      %34 = arith.cmpi eq, %33, %32 : vector<128x8xi32>
      %cst_21 = arith.constant -1.000000e+30 : f32
      %35 = vector.shape_cast %30 : vector<128x1xf32> to vector<128x1xf32>
      %36 = vector.broadcast %35 : vector<128x1xf32> to vector<128x8xf32>
      %37 = vector.broadcast %cst_21 : f32 to vector<128x8xf32>
      %38 = arith.select %34, %36, %37 : vector<128x8xi1>, vector<128x8xf32>
      %cst_22 = arith.constant dense<0xFF800000> : vector<8xf32>
      %39 = vector.multi_reduction <maximumf>, %38, %cst_22 [0] : vector<128x8xf32> to vector<8xf32>
      %40 = vector.shape_cast %39 : vector<8xf32> to vector<1x8xf32>
      %cst_23 = arith.constant 0.000000e+00 : f32
      %41 = vector.shape_cast %40 : vector<1x8xf32> to vector<1x8xf32>
      %42 = vector.broadcast %41 : vector<1x8xf32> to vector<128x8xf32>
      %43 = vector.broadcast %cst_23 : f32 to vector<128x8xf32>
      %44 = arith.select %34, %42, %43 : vector<128x8xi1>, vector<128x8xf32>
      %cst_24 = arith.constant dense<0.000000e+00> : vector<128xf32>
      %45 = vector.multi_reduction <add>, %44, %cst_24 [1] : vector<128x8xf32> to vector<128xf32>
      %46 = vector.shape_cast %45 : vector<128xf32> to vector<128x1xf32>
      %47 = arith.subf %30, %46 : vector<128x1xf32>
      %48 = math.exp %47 : vector<128x1xf32>
      %49 = tpu.iota {dimensions = array<i32: 0>} : vector<8x128xi32>
      %c0_25 = arith.constant 0 : index
      %c0_26 = arith.constant 0 : index
      %50 = vector.load %arg6[%c0_25, %c0_26] : memref<1x128xi32, #tpu.memory_space<vmem>>, vector<1x128xi32>
      %51 = vector.broadcast %50 : vector<1x128xi32> to vector<8x128xi32>
      %52 = arith.cmpi eq, %49, %51 : vector<8x128xi32>
      %53 = arith.extui %52 : vector<8x128xi1> to vector<8x128xi32>
      %54 = arith.sitofp %53 : vector<8x128xi32> to vector<8x128xf32>
      %cst_27 = arith.constant dense<0.000000e+00> : vector<8x1xf32>
      %55 = tpu.matmul %54, %48, %cst_27 {dimension_numbers = #tpu.dot_dimension_numbers<[1], [0], [0], [1], [0, 0, 1, 1], [], []>} : vector<8x128xf32>, vector<128x1xf32>, vector<8x1xf32> -> vector<8x1xf32>
      %56 = vector.broadcast %48 : vector<128x1xf32> to vector<128x128xf32>
      %57 = arith.mulf %24, %56 : vector<128x128xf32>
      %cst_28 = arith.constant dense<0.000000e+00> : vector<8x128xf32>
      %58 = tpu.matmul %54, %57, %cst_28 {dimension_numbers = #tpu.dot_dimension_numbers<[1], [0], [0], [1], [0, 0, 1, 1], [], []>} : vector<8x128xf32>, vector<128x128xf32>, vector<8x128xf32> -> vector<8x128xf32>
      %cst_29 = arith.constant 1.000000e-16 : f32
      %59 = vector.broadcast %cst_29 : f32 to vector<8x1xf32>
      %60 = arith.addf %55, %59 : vector<8x1xf32>
      %61 = tpu.reciprocal %60 {approx = true} : vector<8x1xf32> -> vector<8x1xf32>
      %62 = vector.broadcast %61 : vector<8x1xf32> to vector<8x128xf32>
      %63 = arith.mulf %58, %62 : vector<8x128xf32>
      %c0_30 = arith.constant 0 : index
      %c0_31 = arith.constant 0 : index
      %64 = vector.load %arg8[%c0_30, %c0_31] : memref<8x128xf32, #tpu.memory_space<vmem>>, vector<8x128xf32>
      tpu.vector_store %arg8[%c0_30, %c0_31], %63 {strides = array<i32>} : memref<8x128xf32, #tpu.memory_space<vmem>>, vector<8x128xf32>,
    } else {
    }
    return
  }
  func.func @transform_0(%arg0: i32) -> (i32, i32) {
    %c0_i32 = arith.constant 0 : i32
    %c0_i32_0 = arith.constant 0 : i32
    %c0_i32_1 = arith.constant 0 : i32
    return %c0_i32, %c0_i32_0 : i32, i32
  }
  func.func @transform_1(%arg0: i32) -> (i32, i32) {
    %c0_i32 = arith.constant 0 : i32
    %c0_i32_0 = arith.constant 0 : i32
    %c0_i32_1 = arith.constant 0 : i32
    return %c0_i32, %c0_i32_0 : i32, i32
  }
  func.func @transform_2(%arg0: i32) -> (i32, i32) {
    %c0_i32 = arith.constant 0 : i32
    %c0_i32_0 = arith.constant 0 : i32
    %c0_i32_1 = arith.constant 0 : i32
    return %c0_i32, %c0_i32_0 : i32, i32
  }
  func.func @transform_3(%arg0: i32) -> (i32, i32) {
    %c0_i32 = arith.constant 0 : i32
    %c0_i32_0 = arith.constant 0 : i32
    return %arg0, %c0_i32 : i32, i32
  }
  func.func @transform_4(%arg0: i32) -> (i32, i32) {
    %c0_i32 = arith.constant 0 : i32
    %c0_i32_0 = arith.constant 0 : i32
    return %c0_i32, %arg0 : i32, i32
  }
  func.func @transform_5(%arg0: i32) -> (i32, i32) {
    %c0_i32 = arith.constant 0 : i32
    %c0_i32_0 = arith.constant 0 : i32
    %c0_i32_1 = arith.constant 0 : i32
    return %c0_i32, %c0_i32_0 : i32, i32
  }
  func.func @transform_6(%arg0: i32) -> (i32, i32) {
    %c0_i32 = arith.constant 0 : i32
    %c0_i32_0 = arith.constant 0 : i32
    %c0_i32_1 = arith.constant 0 : i32
    return %c0_i32, %c0_i32_0 : i32, i32
  }
  func.func @transform_7(%arg0: i32) -> (i32, i32) {
    %c0_i32 = arith.constant 0 : i32
    %c0_i32_0 = arith.constant 0 : i32
    %c0_i32_1 = arith.constant 0 : i32
    return %c0_i32, %c0_i32_0 : i32, i32
  }
}

</mosaic_0001>

<bundles_post_ra>
// kernel: global_attention_pool.1
= control target key start
LH: loop header
LB: loop body
LE: loop exit
PB: predicated region body
PF: predicated region fallthrough
CT: control target
= control target key end

     0   :  { %s1727_s26 = smov 0   ;;  %s2379_s0 = inlined_call_operand.vmem [shape: f32[128,128], index: 0, kind: input, shape index: {}]   ;;  %s2380_s1 = inlined_call_operand.vmem [shape: f32[128,128], index: 1, kind: input, shape index: {}]   ;;  %s2381_s2 = inlined_call_operand.<no memory space> [shape: f32[1,1], index: 2, kind: input, shape index: {}]   ;;  %s2382_s3 = inlined_call_operand.vmem [shape: s32[256,1], index: 3, kind: input, shape index: {}]   ;;  %s2383_s4 = inlined_call_operand.vmem [shape: s32[1,256], index: 4, kind: input, shape index: {}]   ;;  %s2384_s5 = inlined_call_operand.vmem [shape: s32[1,128], index: 5, kind: input, shape index: {}]   ;;  %s2385_s6 = inlined_call_operand.vmem [shape: s32[128,1], index: 6, kind: input, shape index: {}]   ;;  %s2386_s7 = inlined_call_operand.vmem [shape: f32[8,128], index: 7, kind: output, shape index: {}]  }
   0x1   :  { %v12_v0 = vstv %s2381_s2 }
   0x2   :  { %13 = vst [vmem:[#allocation4] sm:$0x1] %v12_v0 }
   0x3 LB: > { %s1733_s27 = sadd.s32 4294967295, %s1676_s26   ;;  %p1459_p0 = scmp.ge.s32.totalorder %s1676_s26, 1  ;;  %s1676_s26 = sphi %s1727_s26, %s19_s26  }
   0x4   : > { %p243_p1 = scmp.lt.s32.totalorder %s1676_s26, 3 }
   0x6   : > { %p244_p2 = pnand %p1459_p0, %p243_p1 }
   0x7   : > { %s1460_s2 = sshll.u32 (!%p244_p2), %s1733_s27, 4  ;;  %p279_p3 = scmp.lt.s32.totalorder (!%p244_p2), %s1733_s27, 1 }
   0x8   : > { %247 = sbr.rel (%p244_p2) target bundleno = 1457 (0x5b1), region = 48  ;;  %p274_p4 = scmp.lt.s32.totalorder (!%p244_p2), %s1460_s2, 31 }
   0x9   : > { %p1462_p5 = scmp.ne.s32.totalorder (!%p244_p2), %s1733_s27, 0 }
   0xd   : > { %s1740_s28 = scalar_select %p279_p3, %s1733_s27, 1 }
   0xe   : > { %s2390_s2 = smov (!%p274_p4, %s1460_s2), 31  ;;  %285 = sbr.rel (%p1462_p5) target bundleno = 209 (0xd1), region = 52 }
   0xf   : > { %s281_s8 = scalar_lea.vmem %s2383_s4, %s1740_s28  ;;  %s1461_s9 = sshll.u32 %s2390_s2, 3 }
  0x10   : > { %s1749_s12 = scalar_lea.vmem %s2382_s3, %s1461_s9 }
  0x13   : > { %v317_v1 = vld [vmem:[%s2380_s1 + $0x78] sm:$0xff]  ;;  %v316_v2 = vld [vmem:[%s2380_s1 + $0x70] sm:$0xff]  ;;  %v315_v3 = vld [vmem:[%s2380_s1 + $0x68] sm:$0xff]  ;;  %vm399_vm0 = vcmask 7168   ;;  %v1678_v33 = vmov 0.0  }
  0x14   : > { %1534 = vmatpush.msra.mxu2 %v317_v1  ;;  %1535 = vmatpush.msra.mxu3 %v317_v1  ;;  %v314_v4 = vld [vmem:[%s2380_s1 + $0x60] sm:$0xff]  ;;  %v313_v5 = vld [vmem:[%s2380_s1 + $0x58] sm:$0xff]  ;;  %v312_v6 = vld [vmem:[%s2380_s1 + $0x50] sm:$0xff]  ;;  %400 = vst.msk [vmem:[#allocation3] sm:$0xff] %vm399_vm0, %v1678_v33 }
  0x15   : > { %318 = vmatpush.msra.mxu0 %v317_v1  ;;  %1533 = vmatpush.msra.mxu1 %v317_v1  ;;  %v311_v7 = vld [vmem:[%s2380_s1 + $0x48] sm:$0xff]  ;;  %v310_v8 = vld [vmem:[%s2380_s1 + $0x40] sm:$0xff]  ;;  %v309_v9 = vld [vmem:[%s2380_s1 + $0x38] sm:$0xff]  ;;  %401 = vst.msk [vmem:[#allocation3 + $0x8] sm:$0xff] %vm399_vm0, %v1678_v33 }
  0x16   : > { %1537 = vmatpush.msra.mxu2 %v316_v2  ;;  %1538 = vmatpush.msra.mxu3 %v316_v2  ;;  %v308_v10 = vld [vmem:[%s2380_s1 + $0x30] sm:$0xff]  ;;  %v307_v11 = vld [vmem:[%s2380_s1 + $0x28] sm:$0xff]  ;;  %v306_v12 = vld [vmem:[%s2380_s1 + $0x20] sm:$0xff]  ;;  %402 = vst.msk [vmem:[#allocation3 + $0x10] sm:$0xff] %vm399_vm0, %v1678_v33 }
  0x17   : > { %319 = vmatpush.msra.mxu0 %v316_v2  ;;  %1536 = vmatpush.msra.mxu1 %v316_v2  ;;  %v305_v13 = vld [vmem:[%s2380_s1 + $0x18] sm:$0xff]  ;;  %v304_v14 = vld [vmem:[%s2380_s1 + $0x10] sm:$0xff]  ;;  %v303_v15 = vld [vmem:[%s2380_s1 + $0x8] sm:$0xff]  ;;  %403 = vst.msk [vmem:[#allocation3 + $0x18] sm:$0xff] %vm399_vm0, %v1678_v33 }
  0x18   : > { %1540 = vmatpush.msra.mxu2 %v315_v3  ;;  %1541 = vmatpush.msra.mxu3 %v315_v3  ;;  %v302_v16 = vld [vmem:[%s2380_s1] sm:$0xff]  ;;  %v295_v21 = vld [vmem:[%s2379_s0 + $0x48] sm:$0xff]  ;;  %v296_v25 = vld [vmem:[%s2379_s0 + $0x50] sm:$0xff]  ;;  %404 = vst.msk [vmem:[#allocation3 + $0x20] sm:$0xff] %vm399_vm0, %v1678_v33 }
  0x19   : > { %320 = vmatpush.msra.mxu0 %v315_v3  ;;  %1539 = vmatpush.msra.mxu1 %v315_v3  ;;  %v294_v17 = vld [vmem:[%s2379_s0 + $0x40] sm:$0xff]  ;;  %v299_v22 = vld [vmem:[%s2379_s0 + $0x68] sm:$0xff]  ;;  %v300_v26 = vld [vmem:[%s2379_s0 + $0x70] sm:$0xff]  ;;  %405 = vst.msk [vmem:[#allocation3 + $0x28] sm:$0xff] %vm399_vm0, %v1678_v33 }
  0x1a   : > { %1543 = vmatpush.msra.mxu2 %v314_v4  ;;  %1544 = vmatpush.msra.mxu3 %v314_v4  ;;  %v298_v18 = vld [vmem:[%s2379_s0 + $0x60] sm:$0xff]  ;;  %v287_v23 = vld [vmem:[%s2379_s0 + $0x8] sm:$0xff]  ;;  %v288_v27 = vld [vmem:[%s2379_s0 + $0x10] sm:$0xff]  ;;  %406 = vst.msk [vmem:[#allocation3 + $0x30] sm:$0xff] %vm399_vm0, %v1678_v33 }
  0x1b   : > { %321 = vmatpush.msra.mxu0 %v314_v4  ;;  %1542 = vmatpush.msra.mxu1 %v314_v4  ;;  %v286_v19 = vld [vmem:[%s2379_s0] sm:$0xff]  ;;  %v291_v24 = vld [vmem:[%s2379_s0 + $0x28] sm:$0xff]  ;;  %v292_v28 = vld [vmem:[%s2379_s0 + $0x30] sm:$0xff]  ;;  %407 = vst.msk [vmem:[#allocation3 + $0x38] sm:$0xff] %vm399_vm0, %v1678_v33 }
  0x1c   : > { %1546 = vmatpush.msra.mxu2 %v313_v5  ;;  %1547 = vmatpush.msra.mxu3 %v313_v5  ;;  %v290_v20 = vld [vmem:[%s2379_s0 + $0x20] sm:$0xff]  ;;  %v297_v29 = vld [vmem:[%s2379_s0 + $0x58] sm:$0xff]  ;;  %408 = vst.msk [vmem:[#allocation3 + $0x40] sm:$0xff] %vm399_vm0, %v1678_v33 }
  0x1d   : > { %322 = vmatpush.msra.mxu0 %v313_v5  ;;  %1545 = vmatpush.msra.mxu1 %v313_v5  ;;  %v301_v30 = vld [vmem:[%s2379_s0 + $0x78] sm:$0xff]  ;;  %409 = vst.msk [vmem:[#allocation3 + $0x48] sm:$0xff] %vm399_vm0, %v1678_v33 }
  0x1e   : > { %1549 = vmatpush.msra.mxu2 %v312_v6  ;;  %1550 = vmatpush.msra.mxu3 %v312_v6  ;;  %v289_v31 = vld [vmem:[%s2379_s0 + $0x18] sm:$0xff]  ;;  %410 = vst.msk [vmem:[#allocation3 + $0x50] sm:$0xff] %vm399_vm0, %v1678_v33 }
  0x1f   : > { %323 = vmatpush.msra.mxu0 %v312_v6  ;;  %1548 = vmatpush.msra.mxu1 %v312_v6  ;;  %v293_v32 = vld [vmem:[%s2379_s0 + $0x38] sm:$0xff]  ;;  %411 = vst.msk [vmem:[#allocation3 + $0x58] sm:$0xff] %vm399_vm0, %v1678_v33 }
  0x20   : > { %1552 = vmatpush.msra.mxu2 %v311_v7  ;;  %1553 = vmatpush.msra.mxu3 %v311_v7  ;;  %412 = vst.msk [vmem:[#allocation3 + $0x60] sm:$0xff] %vm399_vm0, %v1678_v33 }
  0x21   : > { %324 = vmatpush.msra.mxu0 %v311_v7  ;;  %1551 = vmatpush.msra.mxu1 %v311_v7  ;;  %413 = vst.msk [vmem:[#allocation3 + $0x68] sm:$0xff] %vm399_vm0, %v1678_v33 }
  0x22   : > { %1555 = vmatpush.msra.mxu2 %v310_v8  ;;  %1556 = vmatpush.msra.mxu3 %v310_v8  ;;  %414 = vst.msk [vmem:[#allocation3 + $0x70] sm:$0xff] %vm399_vm0, %v1678_v33 }
  0x23   : > { %325 = vmatpush.msra.mxu0 %v310_v8  ;;  %1554 = vmatpush.msra.mxu1 %v310_v8  ;;  %415 = vst.msk [vmem:[#allocation3 + $0x78] sm:$0xff] %vm399_vm0, %v1678_v33 }
  0x24   : > { %1558 = vmatpush.msra.mxu2 %v309_v9  ;;  %1559 = vmatpush.msra.mxu3 %v309_v9 }
  0x25   : > { %326 = vmatpush.msra.mxu0 %v309_v9  ;;  %1557 = vmatpush.msra.mxu1 %v309_v9 }
  0x26   : > { %1561 = vmatpush.msra.mxu2 %v308_v10  ;;  %1562 = vmatpush.msra.mxu3 %v308_v10 }
  0x27   : > { %327 = vmatpush.msra.mxu0 %v308_v10  ;;  %1560 = vmatpush.msra.mxu1 %v308_v10 }
  0x28   : > { %1564 = vmatpush.msra.mxu2 %v307_v11  ;;  %1565 = vmatpush.msra.mxu3 %v307_v11 }
  0x29   : > { %328 = vmatpush.msra.mxu0 %v307_v11  ;;  %1563 = vmatpush.msra.mxu1 %v307_v11 }
  0x2a   : > { %1567 = vmatpush.msra.mxu2 %v306_v12  ;;  %1568 = vmatpush.msra.mxu3 %v306_v12 }
  0x2b   : > { %329 = vmatpush.msra.mxu0 %v306_v12  ;;  %1566 = vmatpush.msra.mxu1 %v306_v12 }
  0x2c   : > { %1570 = vmatpush.msra.mxu2 %v305_v13  ;;  %1571 = vmatpush.msra.mxu3 %v305_v13 }
  0x2d   : > { %330 = vmatpush.msra.mxu0 %v305_v13  ;;  %1569 = vmatpush.msra.mxu1 %v305_v13 }
  0x2e   : > { %1573 = vmatpush.msra.mxu2 %v304_v14  ;;  %1574 = vmatpush.msra.mxu3 %v304_v14 }
  0x2f   : > { %331 = vmatpush.msra.mxu0 %v304_v14  ;;  %1572 = vmatpush.msra.mxu1 %v304_v14 }
  0x30   : > { %1576 = vmatpush.msra.mxu2 %v303_v15  ;;  %1577 = vmatpush.msra.mxu3 %v303_v15 }
  0x31   : > { %332 = vmatpush.msra.mxu0 %v303_v15  ;;  %1575 = vmatpush.msra.mxu1 %v303_v15 }
  0x32   : > { %1579 = vmatpush.msra.mxu2 %v302_v16  ;;  %1580 = vmatpush.msra.mxu3 %v302_v16 }
  0x33   : > { %358 = vmatmul.f32.vlgmr.msra.gmra.mxu2 %v294_v17  ;;  %370 = vmatmul.f32.vlgmr.msra.gmra.mxu3 %v298_v18 }
  0x34   : > { %333 = vmatpush.msra.mxu0 %v302_v16  ;;  %1578 = vmatpush.msra.mxu1 %v302_v16 }
  0x35   : > { %334 = vmatmul.f32.vlgmr.msra.gmra.mxu0 %v286_v19  ;;  %346 = vmatmul.f32.vlgmr.msra.gmra.mxu1 %v290_v20 }
  0x3b   : > { %361 = vmatmul.f32.gmra.mxu2 %v295_v21  ;;  %373 = vmatmul.f32.gmra.mxu3 %v299_v22 }
  0x3d   : > { %337 = vmatmul.f32.gmra.mxu0 %v287_v23  ;;  %349 = vmatmul.f32.gmra.mxu1 %v291_v24 }
  0x43   : > { %364 = vmatmul.f32.gmra.mxu2 %v296_v25  ;;  %376 = vmatmul.f32.gmra.mxu3 %v300_v26 }
  0x45   : > { %340 = vmatmul.f32.gmra.mxu0 %v288_v27  ;;  %352 = vmatmul.f32.gmra.mxu1 %v292_v28 }
  0x4b   : > { %367 = vmatmul.f32.gmra.mxu2 %v297_v29  ;;  %379 = vmatmul.f32.gmra.mxu3 %v301_v30 }
  0x4d   : > { %343 = vmatmul.f32.gmra.mxu0 %v289_v31  ;;  %355 = vmatmul.f32.gmra.mxu1 %v293_v32 }
  0xb2   : > { %v335_v34 = vpop.f32.mrf.mxu0  ;;  %v347_v35 = vpop.f32.mrf.mxu1 }
  0xb3   : > { %383 = vst [vmem:[#allocation2 + $0x30] sm:$0xff] %v335_v34 }
  0xb4   : > { %387 = vst [vmem:[#allocation2 + $0x50] sm:$0xff] %v347_v35 }
  0xb6   : > { %v359_v36 = vpop.f32.mrf.mxu2  ;;  %v371_v37 = vpop.f32.mrf.mxu3 }
  0xb7   : > { %391 = vst [vmem:[#allocation2 + $0x40] sm:$0xff] %v359_v36 }
  0xb8   : > { %395 = vst [vmem:[#allocation2 + $0x60] sm:$0xff] %v371_v37 }
  0xba   : > { %v338_v38 = vpop.f32.mrf.mxu0  ;;  %v350_v39 = vpop.f32.mrf.mxu1 }
  0xbb   : > { %384 = vst [vmem:[#allocation2] sm:$0xff] %v338_v38 }
  0xbc   : > { %388 = vst [vmem:[#allocation2 + $0x68] sm:$0xff] %v350_v39 }
  0xbe   : > { %v362_v40 = vpop.f32.mrf.mxu2  ;;  %v374_v41 = vpop.f32.mrf.mxu3 }
  0xbf   : > { %392 = vst [vmem:[#allocation2 + $0x20] sm:$0xff] %v362_v40 }
  0xc0   : > { %396 = vst [vmem:[#allocation2 + $0x70] sm:$0xff] %v374_v41 }
  0xc2   : > { %v341_v42 = vpop.f32.mrf.mxu0  ;;  %v353_v43 = vpop.f32.mrf.mxu1 }
  0xc3   : > { %385 = vst [vmem:[#allocation2 + $0x58] sm:$0xff] %v341_v42 }
  0xc4   : > { %389 = vst [vmem:[#allocation2 + $0x8] sm:$0xff] %v353_v43 }
  0xc6   : > { %v365_v44 = vpop.f32.mrf.mxu2  ;;  %v377_v45 = vpop.f32.mrf.mxu3 }
  0xc7   : > { %393 = vst [vmem:[#allocation2 + $0x10] sm:$0xff] %v365_v44 }
  0xc8   : > { %397 = vst [vmem:[#allocation2 + $0x78] sm:$0xff] %v377_v45 }
  0xca   : > { %v344_v46 = vpop.f32.mrf.mxu0  ;;  %v356_v47 = vpop.f32.mrf.mxu1 }
  0xcb   : > { %386 = vst [vmem:[#allocation2 + $0x18] sm:$0xff] %v344_v46 }
  0xcc   : > { %390 = vst [vmem:[#allocation2 + $0x48] sm:$0xff] %v356_v47 }
  0xce   : > { %v368_v48 = vpop.f32.mrf.mxu2  ;;  %v380_v49 = vpop.f32.mrf.mxu3 }
  0xcf   : > { %394 = vst [vmem:[#allocation2 + $0x38] sm:$0xff] %v368_v48 }
  0xd0   : > { %398 = vst [vmem:[#allocation2 + $0x28] sm:$0xff] %v380_v49 }
  0xd1 PF: > { %v442_v50 = vld [vmem:[%s1749_s12 + $0x50] sm:$0xff]  ;;  %v440_v51 = vld [vmem:[%s1749_s12 + $0x40] sm:$0xff]  ;;  %v1679_v52 = vmov 0   ;;  %v443_v53 = vld [vmem:[%s1749_s12 + $0x58] sm:$0xff]  ;;  %v448_v19 = vlaneseq  ;;  %v1680_v23 = vmov 1.0   ;;  %p1527_p6 = scmp.ne.s32.totalorder %s1733_s27, 1 }
  0xd2   : > { %1628 = vset.pattern.permute.xlu1 %v1679_v52  ;;  %1627 = vset.pattern.permute.xlu0 %v1679_v52  ;;  %v441_v54 = vld [vmem:[%s1749_s12 + $0x48] sm:$0xff]  ;;  %v432_v55 = vld [vmem:[%s1749_s12] sm:$0xff]  ;;  %v430_v58 = vld [vmem:[#allocation2 + $0x78] sm:$0xff]  ;;  %s1681_s28 = smov (!%p1527_p6), 127  }
  0xd3   : > { %481 = vperm.xlu1 %1628, %v442_v50   ;;  %475 = vperm.xlu0 %1627, %v440_v51   ;;  %v433_v56 = vld [vmem:[%s1749_s12 + $0x8] sm:$0xff]  ;;  %v429_v59 = vld [vmem:[#allocation2 + $0x70] sm:$0xff]  ;;  %v428_v60 = vld [vmem:[#allocation2 + $0x60] sm:$0xff]  ;;  %v1881_v20 = vand.u32 127, %v448_v19 }
  0xd4   : > { %1629 = vset.pattern.permute.xlu2 %v1679_v52  ;;  %v444_v61 = vld [vmem:[%s1749_s12 + $0x60] sm:$0xff]  ;;  %v434_v62 = vld [vmem:[%s1749_s12 + $0x10] sm:$0xff]  ;;  %v445_v0 = vld [vmem:[%s1749_s12 + $0x68] sm:$0xff] }
  0xd5   : > { %484 = vperm.xlu2 %1629, %v443_v53   ;;  %v426_v1 = vld [vmem:[#allocation2 + $0x10] sm:$0xff]  ;;  %v425_v2 = vld [vmem:[#allocation2 + $0x20] sm:$0xff]  ;;  %v435_v4 = vld [vmem:[%s1749_s12 + $0x18] sm:$0xff] }
  0xd6   : > { %v427_v63 = vld [vmem:[#allocation2 + $0x38] sm:$0xff]  ;;  %v424_v3 = vld [vmem:[#allocation2 + $0x40] sm:$0xff]  ;;  %v446_v5 = vld [vmem:[%s1749_s12 + $0x70] sm:$0xff] }
  0xd7   : > { %v431_v57 = vld [vmem:[#allocation2 + $0x28] sm:$0xff]  ;;  %v436_v7 = vld [vmem:[%s1749_s12 + $0x20] sm:$0xff]  ;;  %v447_v9 = vld [vmem:[%s1749_s12 + $0x78] sm:$0xff] }
  0xd8   : > { %1581 = vmatpush.msra.mxu2 %v431_v57  ;;  %546 = vmatpush.msra.mxu0 %v431_v57  ;;  %v423_v6 = vld [vmem:[#allocation2 + $0x48] sm:$0xff]  ;;  %v438_v11 = vld [vmem:[%s1749_s12 + $0x30] sm:$0xff]  ;;  %v439_v12 = vld [vmem:[%s1749_s12 + $0x38] sm:$0xff] }
  0xd9   : > { %v422_v8 = vld [vmem:[#allocation2 + $0x8] sm:$0xff]  ;;  %v420_v14 = vld [vmem:[#allocation2 + $0x50] sm:$0xff]  ;;  %v419_v15 = vld [vmem:[#allocation2 + $0x18] sm:$0xff] }
  0xda   : > { %1582 = vmatpush.msra.mxu2 %v430_v58  ;;  %547 = vmatpush.msra.mxu0 %v430_v58  ;;  %v437_v10 = vld [vmem:[%s1749_s12 + $0x28] sm:$0xff]  ;;  %v418_v16 = vld [vmem:[#allocation2 + $0x58] sm:$0xff]  ;;  %v417_v17 = vld [vmem:[#allocation2] sm:$0xff] }
  0xdb   : > { %478 = vperm.xlu0 %1627, %v441_v54   ;;  %451 = vperm.xlu1 %1628, %v432_v55   ;;  %v421_v13 = vld [vmem:[#allocation2 + $0x68] sm:$0xff]  ;;  %v416_v18 = vld [vmem:[#allocation2 + $0x30] sm:$0xff]  ;;  %v1916_v54 = vshrl.u32 %v448_v19, 7 }
  0xdc   : > { %1583 = vmatpush.msra.mxu2 %v429_v59  ;;  %548 = vmatpush.msra.mxu0 %v429_v59 }
  0xdd   : > { %454 = vperm.xlu2 %1629, %v433_v56   ;;  %v621_v55 = vadd.s32 64, %v1916_v54  ;;  %v1630_v56 = vld [vmem:[%s281_s8] ss:$0 sm:$0xff]  ;;  %v622_v57 = vadd.s32 72, %v1916_v54  ;;  %v614_v58 = vadd.s32 8, %v1916_v54  ;;  %v623_v59 = vadd.s32 80, %v1916_v54 }
  0xde   : > { %1584 = vmatpush.msra.mxu2 %v428_v60  ;;  %549 = vmatpush.msra.mxu0 %v428_v60  ;;  %v615_v60 = vadd.s32 16, %v1916_v54 }
  0xe0   : > { %1585 = vmatpush.msra.mxu2 %v427_v63  ;;  %550 = vmatpush.msra.mxu0 %v427_v63  ;;  %v625_v63 = vadd.s32 96, %v1916_v54 }
  0xe2   : > { %1586 = vmatpush.msra.mxu2 %v426_v1  ;;  %551 = vmatpush.msra.mxu0 %v426_v1  ;;  %v626_v1 = vadd.s32 104, %v1916_v54 }
  0xe3   : > { %487 = vperm.xlu0 %1627, %v444_v61   ;;  %457 = vperm.xlu1 %1628, %v434_v62   ;;  %v624_v61 = vadd.s32 88, %v1916_v54  ;;  %v616_v62 = vadd.s32 24, %v1916_v54 }
  0xe4   : > { %1587 = vmatpush.msra.mxu2 %v425_v2  ;;  %552 = vmatpush.msra.mxu0 %v425_v2  ;;  %v618_v2 = vadd.s32 40, %v1916_v54 }
  0xe5   : > { %490 = vperm.xlu2 %1629, %v445_v0   ;;  %v617_v0 = vadd.s32 32, %v1916_v54 }
  0xe6   : > { %1588 = vmatpush.msra.mxu2 %v424_v3  ;;  %553 = vmatpush.msra.mxu0 %v424_v3  ;;  %v627_v3 = vadd.s32 112, %v1916_v54 }
  0xe8   : > { %1589 = vmatpush.msra.mxu2 %v423_v6  ;;  %554 = vmatpush.msra.mxu0 %v423_v6  ;;  %v620_v6 = vadd.s32 56, %v1916_v54 }
  0xea   : > { %1590 = vmatpush.msra.mxu2 %v422_v8  ;;  %555 = vmatpush.msra.mxu0 %v422_v8 }
  0xeb   : > { %460 = vperm.xlu0 %1627, %v435_v4   ;;  %493 = vperm.xlu1 %1628, %v446_v5   ;;  %v619_v4 = vadd.s32 48, %v1916_v54  ;;  %v628_v5 = vadd.s32 120, %v1916_v54 }
  0xec   : > { %1591 = vmatpush.msra.mxu2 %v421_v13  ;;  %556 = vmatpush.msra.mxu0 %v421_v13 }
  0xed   : > { %463 = vperm.xlu2 %1629, %v436_v7   ;;  %v678_v7 = vld [vmem:[#allocation3] sm:$0xff] }
  0xee   : > { %1592 = vmatpush.msra.mxu2 %v420_v14  ;;  %557 = vmatpush.msra.mxu0 %v420_v14 }
  0xf0   : > { %1593 = vmatpush.msra.mxu2 %v419_v15  ;;  %558 = vmatpush.msra.mxu0 %v419_v15 }
  0xf2   : > { %1594 = vmatpush.msra.mxu2 %v418_v16  ;;  %559 = vmatpush.msra.mxu0 %v418_v16  ;;  %v687_v16 = vld [vmem:[#allocation3 + $0x48] sm:$0xff] }
  0xf3   : > { %496 = vperm.xlu0 %1627, %v447_v9   ;;  %466 = vperm.xlu1 %1628, %v437_v10   ;;  %v686_v10 = vld [vmem:[#allocation3 + $0x40] sm:$0xff] }
  0xf4   : > { %1595 = vmatpush.msra.mxu2 %v417_v17  ;;  %560 = vmatpush.msra.mxu0 %v417_v17 }
  0xf5   : > { %469 = vperm.xlu2 %1629, %v438_v11  }
  0xf6   : > { %1596 = vmatpush.msra.mxu2 %v416_v18  ;;  %561 = vmatpush.msra.mxu0 %v416_v18  ;;  %v680_v18 = vld [vmem:[#allocation3 + $0x10] sm:$0xff] }
  0xfb   : > { %472 = vperm.xlu0 %1627, %v439_v12   ;;  %v679_v12 = vld [vmem:[#allocation3 + $0x8] sm:$0xff] }
 0x12f   : > { %v485_v24 = vpop.permute.xlu2 %484 }
 0x130   : > { %vm509_vm6 = vcmp.eq.s32.totalorder %v485_v24, %v1881_v20 }
 0x137   : > { %v455_v27 = vpop.permute.xlu2 %454 }
 0x138   : > { %vm499_vm4 = vcmp.eq.s32.totalorder %v455_v27, %v1881_v20 }
 0x13f   : > { %v491_v30 = vpop.permute.xlu2 %490 }
 0x140   : > { %vm511_vm10 = vcmp.eq.s32.totalorder %v491_v30, %v1881_v20 }
 0x145   : > { %v482_v21 = vpop.permute.xlu1 %481  ;;  %v476_v22 = vpop.permute.xlu0 %475 }
 0x146   : > { %vm506_vm1 = vcmp.eq.s32.totalorder %v476_v22, %v1881_v20  ;;  %vm508_vm5 = vcmp.eq.s32.totalorder %v482_v21, %v1881_v20 }
 0x147   : > { %1487 = vmatmul.msk.f32.vlgmr.msra.gmra.mxu2 %vm506_vm1, %v1680_v23  ;;  %v464_v33 = vpop.permute.xlu2 %463  ;;  %vm638_vm1 = vcmp.eq.s32.totalorder %v1630_v56, %v621_v55 }
 0x148   : > { %vm502_vm11 = vcmp.eq.s32.totalorder %v464_v33, %v1881_v20 }
 0x14d   : > { %v479_v25 = vpop.permute.xlu0 %478  ;;  %v452_v26 = vpop.permute.xlu1 %451 }
 0x14e   : > { %vm507_vm2 = vcmp.eq.s32.totalorder %v479_v25, %v1881_v20  ;;  %vm498_vm3 = vcmp.eq.s32.totalorder %v452_v26, %v1881_v20  ;;  %v681_v25 = vld [vmem:[#allocation3 + $0x18] sm:$0xff] }
 0x14f   : > { %1479 = vmatmul.msk.f32.vlgmr.msra.gmra.mxu0 %vm498_vm3, %v1680_v23  ;;  %1488 = vmatmul.msk.f32.gmra.mxu2 %vm507_vm2, %v1680_v23  ;;  %v470_v36 = vpop.permute.xlu2 %469  ;;  %vm630_vm2 = vcmp.eq.s32.totalorder %v1630_v56, %v1916_v54  ;;  %vm639_vm3 = vcmp.eq.s32.totalorder %v1630_v56, %v622_v57 }
 0x150   : > { %vm504_vm14 = vcmp.eq.s32.totalorder %v470_v36, %v1881_v20 }
 0x155   : > { %v488_v28 = vpop.permute.xlu0 %487  ;;  %v458_v29 = vpop.permute.xlu1 %457 }
 0x156   : > { %vm500_vm7 = vcmp.eq.s32.totalorder %v458_v29, %v1881_v20  ;;  %vm510_vm8 = vcmp.eq.s32.totalorder %v488_v28, %v1881_v20  ;;  %v689_v29 = vld [vmem:[#allocation3 + $0x58] sm:$0xff] }
 0x157   : > { %1480 = vmatmul.msk.f32.gmra.mxu0 %vm499_vm4, %v1680_v23  ;;  %1489 = vmatmul.msk.f32.gmra.mxu2 %vm508_vm5, %v1680_v23  ;;  %vm631_vm4 = vcmp.eq.s32.totalorder %v1630_v56, %v614_v58  ;;  %vm640_vm5 = vcmp.eq.s32.totalorder %v1630_v56, %v623_v59 }
 0x15d   : > { %v461_v31 = vpop.permute.xlu0 %460  ;;  %v494_v32 = vpop.permute.xlu1 %493 }
 0x15e   : > { %vm501_vm9 = vcmp.eq.s32.totalorder %v461_v31, %v1881_v20  ;;  %vm512_vm12 = vcmp.eq.s32.totalorder %v494_v32, %v1881_v20  ;;  %v682_v31 = vld [vmem:[#allocation3 + $0x20] sm:$0xff] }
 0x15f   : > { %1481 = vmatmul.msk.f32.gmra.mxu0 %vm500_vm7, %v1680_v23  ;;  %1490 = vmatmul.msk.f32.gmra.mxu2 %vm509_vm6, %v1680_v23  ;;  %vm632_vm6 = vcmp.eq.s32.totalorder %v1630_v56, %v615_v60  ;;  %vm641_vm7 = vcmp.eq.s32.totalorder %v1630_v56, %v624_v61 }
 0x165   : > { %v467_v34 = vpop.permute.xlu1 %466  ;;  %v497_v35 = vpop.permute.xlu0 %496 }
 0x166   : > { %vm503_vm13 = vcmp.eq.s32.totalorder %v467_v34, %v1881_v20  ;;  %vm513_vm15 = vcmp.eq.s32.totalorder %v497_v35, %v1881_v20  ;;  %v690_v35 = vld [vmem:[#allocation3 + $0x60] sm:$0xff] }
 0x167   : > { %1482 = vmatmul.msk.f32.gmra.mxu0 %vm501_vm9, %v1680_v23  ;;  %1491 = vmatmul.msk.f32.gmra.mxu2 %vm510_vm8, %v1680_v23  ;;  %vm633_vm8 = vcmp.eq.s32.totalorder %v1630_v56, %v616_v62  ;;  %vm642_vm9 = vcmp.eq.s32.totalorder %v1630_v56, %v625_v63 }
 0x16d   : > { %v473_v37 = vpop.permute.xlu0 %472 }
 0x16e   : > { %vm505_vm0 = vcmp.eq.s32.totalorder %v473_v37, %v1881_v20  ;;  %v683_v37 = vld [vmem:[#allocation3 + $0x28] sm:$0xff] }
 0x16f   : > { %1483 = vmatmul.msk.f32.gmra.mxu0 %vm502_vm11, %v1680_v23  ;;  %1492 = vmatmul.msk.f32.gmra.mxu2 %vm511_vm10, %v1680_v23  ;;  %vm634_vm10 = vcmp.eq.s32.totalorder %v1630_v56, %v617_v0  ;;  %vm643_vm11 = vcmp.eq.s32.totalorder %v1630_v56, %v626_v1 }
 0x177   : > { %1484 = vmatmul.msk.f32.gmra.mxu0 %vm503_vm13, %v1680_v23  ;;  %1493 = vmatmul.msk.f32.gmra.mxu2 %vm512_vm12, %v1680_v23  ;;  %vm635_vm12 = vcmp.eq.s32.totalorder %v1630_v56, %v618_v2  ;;  %vm644_vm13 = vcmp.eq.s32.totalorder %v1630_v56, %v627_v3 }
 0x17f   : > { %1485 = vmatmul.msk.f32.gmra.mxu0 %vm504_vm14, %v1680_v23  ;;  %1494 = vmatmul.msk.f32.gmra.mxu2 %vm513_vm15, %v1680_v23  ;;  %vm636_vm14 = vcmp.eq.s32.totalorder %v1630_v56, %v619_v4  ;;  %vm645_vm15 = vcmp.eq.s32.totalorder %v1630_v56, %v628_v5 }
 0x187   : > { %1486 = vmatmul.msk.f32.gmra.mxu0 %vm505_vm0, %v1680_v23  ;;  %vm637_vm0 = vcmp.eq.s32.totalorder %v1630_v56, %v620_v6 }
 0x1ca   : > { %v587_v38 = vpop.f32.mrf.mxu2 }
 0x1cc   : > { %v563_v39 = vpop.f32.mrf.mxu0 }
 0x1d2   : > { %v590_v40 = vpop.f32.mrf.mxu2 }
 0x1d4   : > { %v566_v41 = vpop.f32.mrf.mxu0 }
 0x1da   : > { %v593_v42 = vpop.f32.mrf.mxu2 }
 0x1dc   : > { %v569_v43 = vpop.f32.mrf.mxu0 }
 0x1e2   : > { %v596_v44 = vpop.f32.mrf.mxu2 }
 0x1e4   : > { %v572_v45 = vpop.f32.mrf.mxu0 }
 0x1ea   : > { %v599_v46 = vpop.f32.mrf.mxu2 }
 0x1ec   : > { %v575_v48 = vpop.f32.mrf.mxu0 }
 0x1f2   : > { %v602_v47 = vpop.f32.mrf.mxu2 }
 0x1f4   : > { %v578_v50 = vpop.f32.mrf.mxu0 }
 0x1fa   : > { %v605_v49 = vpop.f32.mrf.mxu2 }
 0x1fc   : > { %v581_v52 = vpop.f32.mrf.mxu0 }
 0x202   : > { %v608_v51 = vpop.f32.mrf.mxu2 }
 0x203   : > { %694 = vmatpush.msra.mxu1 %v608_v51  ;;  %1597 = vmatpush.msra.mxu3 %v608_v51 }
 0x204   : > { %v584_v53 = vpop.f32.mrf.mxu0 }
 0x205   : > { %695 = vmatpush.msra.mxu1 %v605_v49  ;;  %1598 = vmatpush.msra.mxu3 %v605_v49  ;;  %v685_v49 = vld [vmem:[#allocation3 + $0x38] sm:$0xff] }
 0x207   : > { %696 = vmatpush.msra.mxu1 %v602_v47  ;;  %1599 = vmatpush.msra.mxu3 %v602_v47  ;;  %v692_v47 = vld [vmem:[#allocation3 + $0x70] sm:$0xff] }
 0x209   : > { %697 = vmatpush.msra.mxu1 %v599_v46  ;;  %1600 = vmatpush.msra.mxu3 %v599_v46 }
 0x20b   : > { %698 = vmatpush.msra.mxu1 %v596_v44  ;;  %1601 = vmatpush.msra.mxu3 %v596_v44 }
 0x20d   : > { %699 = vmatpush.msra.mxu1 %v593_v42  ;;  %1602 = vmatpush.msra.mxu3 %v593_v42 }
 0x20f   : > { %700 = vmatpush.msra.mxu1 %v590_v40  ;;  %1603 = vmatpush.msra.mxu3 %v590_v40 }
 0x211   : > { %701 = vmatpush.msra.mxu1 %v587_v38  ;;  %1604 = vmatpush.msra.mxu3 %v587_v38 }
 0x213   : > { %702 = vmatpush.msra.mxu1 %v584_v53  ;;  %1605 = vmatpush.msra.mxu3 %v584_v53  ;;  %v693_v53 = vld [vmem:[#allocation3 + $0x78] sm:$0xff] }
 0x215   : > { %703 = vmatpush.msra.mxu1 %v581_v52  ;;  %1606 = vmatpush.msra.mxu3 %v581_v52 }
 0x217   : > { %704 = vmatpush.msra.mxu1 %v578_v50  ;;  %1607 = vmatpush.msra.mxu3 %v578_v50 }
 0x219   : > { %705 = vmatpush.msra.mxu1 %v575_v48  ;;  %1608 = vmatpush.msra.mxu3 %v575_v48 }
 0x21b   : > { %706 = vmatpush.msra.mxu1 %v572_v45  ;;  %1609 = vmatpush.msra.mxu3 %v572_v45 }
 0x21d   : > { %707 = vmatpush.msra.mxu1 %v569_v43  ;;  %1610 = vmatpush.msra.mxu3 %v569_v43  ;;  %v684_v43 = vld [vmem:[#allocation3 + $0x30] sm:$0xff] }
 0x21f   : > { %708 = vmatpush.msra.mxu1 %v566_v41  ;;  %1611 = vmatpush.msra.mxu3 %v566_v41  ;;  %v691_v41 = vld [vmem:[#allocation3 + $0x68] sm:$0xff] }
 0x221   : > { %709 = vmatpush.msra.mxu1 %v563_v39  ;;  %1612 = vmatpush.msra.mxu3 %v563_v39 }
 0x222   : > { %1519 = vmatmul.msk.f32.vlgmr.msra.gmra.mxu3 %vm638_vm1, %v1680_v23  ;;  %1511 = vmatmul.msk.f32.vlgmr.msra.gmra.mxu1 %vm630_vm2, %v1680_v23  ;;  %vm775_vm1 = vcmask 7168  }
 0x22a   : > { %1520 = vmatmul.msk.f32.gmra.mxu3 %vm639_vm3, %v1680_v23  ;;  %1512 = vmatmul.msk.f32.gmra.mxu1 %vm631_vm4, %v1680_v23 }
 0x232   : > { %1521 = vmatmul.msk.f32.gmra.mxu3 %vm640_vm5, %v1680_v23  ;;  %1513 = vmatmul.msk.f32.gmra.mxu1 %vm632_vm6, %v1680_v23 }
 0x23a   : > { %1522 = vmatmul.msk.f32.gmra.mxu3 %vm641_vm7, %v1680_v23  ;;  %1514 = vmatmul.msk.f32.gmra.mxu1 %vm633_vm8, %v1680_v23 }
 0x242   : > { %1523 = vmatmul.msk.f32.gmra.mxu3 %vm642_vm9, %v1680_v23  ;;  %1515 = vmatmul.msk.f32.gmra.mxu1 %vm634_vm10, %v1680_v23 }
 0x24a   : > { %1524 = vmatmul.msk.f32.gmra.mxu3 %vm643_vm11, %v1680_v23  ;;  %1516 = vmatmul.msk.f32.gmra.mxu1 %vm635_vm12, %v1680_v23 }
 0x252   : > { %1525 = vmatmul.msk.f32.gmra.mxu3 %vm644_vm13, %v1680_v23  ;;  %1517 = vmatmul.msk.f32.gmra.mxu1 %vm636_vm14, %v1680_v23 }
 0x25a   : > { %1526 = vmatmul.msk.f32.gmra.mxu3 %vm645_vm15, %v1680_v23  ;;  %1518 = vmatmul.msk.f32.gmra.mxu1 %vm637_vm0, %v1680_v23  ;;  %v688_v23 = vld [vmem:[#allocation3 + $0x50] sm:$0xff] }
 0x29f   : > { %v711_v8 = vpop.f32.mrf.mxu1 }
 0x2a0   : > { %v759_v9 = vadd.f32 %v711_v8, %v678_v7 }
 0x2a2   : > { %776 = vst.msk [vmem:[#allocation3] sm:$0xff] %vm775_vm1, %v759_v9 }
 0x2a5   : > { %v735_v11 = vpop.f32.mrf.mxu3 }
 0x2a6   : > { %v767_v13 = vadd.f32 %v735_v11, %v686_v10 }
 0x2a7   : > { %v714_v14 = vpop.f32.mrf.mxu1 }
 0x2a8   : > { %784 = vst.msk [vmem:[#allocation3 + $0x40] sm:$0xff] %vm775_vm1, %v767_v13  ;;  %v760_v15 = vadd.f32 %v714_v14, %v679_v12 }
 0x2aa   : > { %777 = vst.msk [vmem:[#allocation3 + $0x8] sm:$0xff] %vm775_vm1, %v760_v15 }
 0x2ad   : > { %v738_v17 = vpop.f32.mrf.mxu3 }
 0x2ae   : > { %v768_v19 = vadd.f32 %v738_v17, %v687_v16 }
 0x2af   : > { %v717_v21 = vpop.f32.mrf.mxu1 }
 0x2b0   : > { %785 = vst.msk [vmem:[#allocation3 + $0x48] sm:$0xff] %vm775_vm1, %v768_v19  ;;  %v761_v22 = vadd.f32 %v717_v21, %v680_v18 }
 0x2b2   : > { %778 = vst.msk [vmem:[#allocation3 + $0x10] sm:$0xff] %vm775_vm1, %v761_v22 }
 0x2b5   : > { %v741_v24 = vpop.f32.mrf.mxu3 }
 0x2b6   : > { %v769_v26 = vadd.f32 %v741_v24, %v688_v23 }
 0x2b7   : > { %v720_v27 = vpop.f32.mrf.mxu1 }
 0x2b8   : > { %786 = vst.msk [vmem:[#allocation3 + $0x50] sm:$0xff] %vm775_vm1, %v769_v26  ;;  %v762_v28 = vadd.f32 %v720_v27, %v681_v25 }
 0x2ba   : > { %779 = vst.msk [vmem:[#allocation3 + $0x18] sm:$0xff] %vm775_vm1, %v762_v28 }
 0x2bd   : > { %v744_v30 = vpop.f32.mrf.mxu3 }
 0x2be   : > { %v770_v32 = vadd.f32 %v744_v30, %v689_v29 }
 0x2bf   : > { %v723_v33 = vpop.f32.mrf.mxu1 }
 0x2c0   : > { %787 = vst.msk [vmem:[#allocation3 + $0x58] sm:$0xff] %vm775_vm1, %v770_v32  ;;  %v763_v34 = vadd.f32 %v723_v33, %v682_v31 }
 0x2c2   : > { %780 = vst.msk [vmem:[#allocation3 + $0x20] sm:$0xff] %vm775_vm1, %v763_v34 }
 0x2c5   : > { %v747_v36 = vpop.f32.mrf.mxu3 }
 0x2c6   : > { %v771_v38 = vadd.f32 %v747_v36, %v690_v35 }
 0x2c7   : > { %v726_v39 = vpop.f32.mrf.mxu1 }
 0x2c8   : > { %788 = vst.msk [vmem:[#allocation3 + $0x60] sm:$0xff] %vm775_vm1, %v771_v38  ;;  %v764_v40 = vadd.f32 %v726_v39, %v683_v37 }
 0x2ca   : > { %781 = vst.msk [vmem:[#allocation3 + $0x28] sm:$0xff] %vm775_vm1, %v764_v40 }
 0x2cd   : > { %v750_v42 = vpop.f32.mrf.mxu3 }
 0x2ce   : > { %v772_v44 = vadd.f32 %v750_v42, %v691_v41 }
 0x2cf   : > { %v729_v45 = vpop.f32.mrf.mxu1 }
 0x2d0   : > { %789 = vst.msk [vmem:[#allocation3 + $0x68] sm:$0xff] %vm775_vm1, %v772_v44  ;;  %v765_v46 = vadd.f32 %v729_v45, %v684_v43 }
 0x2d2   : > { %782 = vst.msk [vmem:[#allocation3 + $0x30] sm:$0xff] %vm775_vm1, %v765_v46 }
 0x2d5   : > { %v753_v48 = vpop.f32.mrf.mxu3 }
 0x2d6   : > { %v773_v50 = vadd.f32 %v753_v48, %v692_v47 }
 0x2d7   : > { %v732_v51 = vpop.f32.mrf.mxu1 }
 0x2d8   : > { %790 = vst.msk [vmem:[#allocation3 + $0x70] sm:$0xff] %vm775_vm1, %v773_v50  ;;  %v766_v52 = vadd.f32 %v732_v51, %v685_v49 }
 0x2da   : > { %783 = vst.msk [vmem:[#allocation3 + $0x38] sm:$0xff] %vm775_vm1, %v766_v52 }
 0x2dc   : > { %795 = sbr.rel (%p1527_p6) target bundleno = 1457 (0x5b1), region = 56 }
 0x2dd   : > { %v756_v55 = vpop.f32.mrf.mxu3 }
 0x2de   : > { %v774_v56 = vadd.f32 %v756_v55, %v693_v53 }
 0x2e0   : > { %791 = vst.msk [vmem:[#allocation3 + $0x78] sm:$0xff] %vm775_vm1, %v774_v56 }
 0x2e1   : > { %v814_v57 = vld [vmem:[#allocation2 + $0x58] sm:$0xff]  ;;  %v812_v58 = vld [vmem:[#allocation2 + $0x30] sm:$0xff]  ;;  %v813_v61 = vld [vmem:[#allocation2] sm:$0xff]  ;;  %v1682_v63 = vmov 0   ;;  %vm1120_vm4 = vcmask 64512  }
 0x2e2   : > { %864 = vrot.lane.b32.xlu1 %v814_v57, %s1681_s28  ;;  %860 = vrot.lane.b32.xlu0 %v812_v58, %s1681_s28  ;;  %v816_v59 = vld [vmem:[#allocation2 + $0x50] sm:$0xff]  ;;  %v815_v60 = vld [vmem:[#allocation2 + $0x18] sm:$0xff]  ;;  %v817_v62 = vld [vmem:[#allocation2 + $0x68] sm:$0xff] }
 0x2e3   : > { %868 = vrot.lane.b32.xlu2 %v816_v59, %s1681_s28  ;;  %1631 = vset.pattern.permute.xlu1 %v1682_v63  ;;  %v819_v0 = vld [vmem:[#allocation2 + $0x48] sm:$0xff]  ;;  %v820_v2 = vld [vmem:[#allocation2 + $0x40] sm:$0xff]  ;;  %v822_v3 = vld [vmem:[#allocation2 + $0x10] sm:$0xff] }
 0x2e4   : > { %1633 = vset.pattern.permute.xlu0 %v1682_v63  ;;  %1632 = vset.pattern.permute.xlu2 %v1682_v63  ;;  %v818_v1 = vld [vmem:[#allocation2 + $0x8] sm:$0xff]  ;;  %v821_v4 = vld [vmem:[#allocation2 + $0x20] sm:$0xff]  ;;  %v823_v5 = vld [vmem:[#allocation2 + $0x38] sm:$0xff] }
 0x2e5   : > { %v824_v6 = vld [vmem:[#allocation2 + $0x60] sm:$0xff]  ;;  %v825_v7 = vld [vmem:[#allocation2 + $0x70] sm:$0xff]  ;;  %v826_v8 = vld [vmem:[#allocation2 + $0x78] sm:$0xff] }
 0x2e6   : > { %v827_v9 = vld [vmem:[#allocation2 + $0x28] sm:$0xff]  ;;  %v944_v10 = vld [vmem:[%s2385_s6] sm:$0xff]  ;;  %v947_v12 = vld [vmem:[%s2385_s6 + $0x18] sm:$0xff] }
 0x2e7   : > { %v945_v11 = vld [vmem:[%s2385_s6 + $0x8] sm:$0xff]  ;;  %v946_v13 = vld [vmem:[%s2385_s6 + $0x10] sm:$0xff]  ;;  %v948_v14 = vld [vmem:[%s2385_s6 + $0x20] sm:$0xff] }
 0x2e8   : > { %v949_v15 = vld [vmem:[%s2385_s6 + $0x28] sm:$0xff]  ;;  %v951_v16 = vld [vmem:[%s2385_s6 + $0x38] sm:$0xff]  ;;  %v950_v17 = vld [vmem:[%s2385_s6 + $0x30] sm:$0xff] }
 0x2e9   : > { %v953_v18 = vld [vmem:[%s2385_s6 + $0x48] sm:$0xff]  ;;  %v952_v19 = vld [vmem:[%s2385_s6 + $0x40] sm:$0xff]  ;;  %v954_v21 = vld [vmem:[%s2385_s6 + $0x50] sm:$0xff] }
 0x2ea   : > { %866 = vrot.lane.b32.xlu1 %v815_v60, %s1681_s28  ;;  %862 = vrot.lane.b32.xlu0 %v813_v61, %s1681_s28  ;;  %v958_v22 = vld [vmem:[%s2385_s6 + $0x70] sm:$0xff]  ;;  %v955_v23 = vld [vmem:[%s2385_s6 + $0x58] sm:$0xff]  ;;  %v828_v29 = vld [vmem:[#allocation3] sm:$0xff] }
 0x2eb   : > { %870 = vrot.lane.b32.xlu2 %v817_v62, %s1681_s28  ;;  %v956_v24 = vld [vmem:[%s2385_s6 + $0x60] sm:$0xff]  ;;  %v957_v25 = vld [vmem:[%s2385_s6 + $0x68] sm:$0xff]  ;;  %v959_v26 = vld [vmem:[%s2385_s6 + $0x78] sm:$0xff] }
 0x2ec   : > { %v830_v28 = vld [vmem:[#allocation3 + $0x10] sm:$0xff]  ;;  %v2036_v30 = vld [vmem:[#allocation4] ss:$0 sm:$0xff]  ;;  %v833_v35 = vld [vmem:[#allocation3 + $0x28] sm:$0xff] }
 0x2ed   : > { %v831_v40 = vld [vmem:[#allocation3 + $0x18] sm:$0xff]  ;;  %v829_v41 = vld [vmem:[#allocation3 + $0x8] sm:$0xff]  ;;  %v832_v49 = vld [vmem:[#allocation3 + $0x20] sm:$0xff] }
 0x2ee   : > { %v834_v50 = vld [vmem:[#allocation3 + $0x30] sm:$0xff]  ;;  %v836_v57 = vld [vmem:[#allocation3 + $0x40] sm:$0xff]  ;;  %v835_v61 = vld [vmem:[#allocation3 + $0x38] sm:$0xff] }
 0x2ef   : > { %v838_v62 = vld [vmem:[#allocation3 + $0x50] sm:$0xff] }
 0x2f2   : > { %874 = vrot.lane.b32.xlu1 %v819_v0, %s1681_s28  ;;  %872 = vrot.lane.b32.xlu0 %v818_v1, %s1681_s28 }
 0x2f3   : > { %876 = vrot.lane.b32.xlu2 %v820_v2, %s1681_s28 }
 0x2fa   : > { %880 = vrot.lane.b32.xlu1 %v822_v3, %s1681_s28  ;;  %878 = vrot.lane.b32.xlu0 %v821_v4, %s1681_s28  ;;  %v839_v4 = vld [vmem:[#allocation3 + $0x58] sm:$0xff] }
 0x2fb   : > { %882 = vrot.lane.b32.xlu2 %v823_v5, %s1681_s28 }
 0x302   : > { %884 = vrot.lane.b32.xlu0 %v824_v6, %s1681_s28  ;;  %886 = vrot.lane.b32.xlu1 %v825_v7, %s1681_s28 }
 0x303   : > { %888 = vrot.lane.b32.xlu2 %v826_v8, %s1681_s28 }
 0x30a   : > { %890 = vrot.lane.b32.xlu0 %v827_v9, %s1681_s28  ;;  %961 = vperm.xlu1 %1631, %v944_v10   ;;  %v837_v9 = vld [vmem:[#allocation3 + $0x48] sm:$0xff]  ;;  %v840_v10 = vld [vmem:[#allocation3 + $0x60] sm:$0xff] }
 0x30b   : > { %964 = vperm.xlu2 %1632, %v945_v11  }
 0x312   : > { %970 = vperm.xlu1 %1631, %v947_v12   ;;  %967 = vperm.xlu0 %1633, %v946_v13  }
 0x313   : > { %973 = vperm.xlu2 %1632, %v948_v14  }
 0x31a   : > { %976 = vperm.xlu1 %1631, %v949_v15   ;;  %982 = vperm.xlu0 %1633, %v951_v16   ;;  %v841_v15 = vld [vmem:[#allocation3 + $0x68] sm:$0xff] }
 0x31b   : > { %979 = vperm.xlu2 %1632, %v950_v17   ;;  %v842_v17 = vld [vmem:[#allocation3 + $0x70] sm:$0xff] }
 0x322   : > { %988 = vperm.xlu1 %1631, %v953_v18   ;;  %985 = vperm.xlu0 %1633, %v952_v19  }
 0x323   : > { %991 = vperm.xlu2 %1632, %v954_v21  }
 0x32a   : > { %1003 = vperm.xlu1 %1631, %v958_v22   ;;  %994 = vperm.xlu0 %1633, %v955_v23  }
 0x32b   : > { %997 = vperm.xlu2 %1632, %v956_v24   ;;  %v843_v24 = vld [vmem:[#allocation3 + $0x78] sm:$0xff] }
 0x332   : > { %1000 = vperm.xlu0 %1633, %v957_v25  }
 0x333   : > { %1006 = vperm.xlu2 %1632, %v959_v26  }
 0x33d   : > { %v869_v27 = vpop.permute.xlu2 %868 }
 0x33e   : > { %v912_v51 = vadd.f32 %v869_v27, %v832_v49 }
 0x340   : > { %v2062_v59 = vadd.f32 %v2036_v30, %v912_v51 }
 0x345   : > { %v871_v36 = vpop.permute.xlu2 %870 }
 0x346   : > { %v913_v39 = vadd.f32 %v871_v36, %v833_v35 }
 0x348   : > { %v2047_v44 = vadd.f32 %v2036_v30, %v913_v39 }
 0x34d   : > { %v877_v55 = vpop.permute.xlu2 %876 }
 0x34e   : > { %v916_v60 = vadd.f32 %v877_v55, %v836_v57 }
 0x350   : > { %v2067_v2 = vadd.f32 %v2036_v30, %v916_v60 }
 0x354   : > { %v865_v31 = vpop.permute.xlu1 %864  ;;  %v861_v32 = vpop.permute.xlu0 %860 }
 0x355   : > { %v910_v33 = vadd.f32 %v865_v31, %v830_v28  ;;  %v908_v34 = vadd.f32 %v861_v32, %v828_v29  ;;  %v883_v5 = vpop.permute.xlu2 %882 }
 0x356   : > { %v919_v8 = vadd.f32 %v883_v5, %v839_v4 }
 0x357   : > { %v2039_v37 = vadd.f32 %v2036_v30, %v910_v33  ;;  %v2042_v38 = vadd.f32 %v2036_v30, %v908_v34 }
 0x358   : > { %v2079_v13 = vadd.f32 %v2036_v30, %v919_v8 }
 0x359   : > { %1036 = vperm.xlu0 %1633, %v2039_v37   ;;  %1026 = vperm.xlu1 %1631, %v2042_v38  }
 0x35c   : > { %v867_v42 = vpop.permute.xlu1 %866  ;;  %v863_v43 = vpop.permute.xlu0 %862 }
 0x35d   : > { %v911_v45 = vadd.f32 %v867_v42, %v831_v40  ;;  %v909_v46 = vadd.f32 %v863_v43, %v829_v41  ;;  %v889_v21 = vpop.permute.xlu2 %888 }
 0x35e   : > { %v922_v23 = vadd.f32 %v889_v21, %v842_v17 }
 0x35f   : > { %v2050_v47 = vadd.f32 %v2036_v30, %v911_v45  ;;  %v2053_v48 = vadd.f32 %v2036_v30, %v909_v46 }
 0x360   : > { %v2094_v28 = vadd.f32 %v2036_v30, %v922_v23 }
 0x361   : > { %1051 = vperm.xlu0 %1633, %v2047_v44   ;;  %1041 = vperm.xlu1 %1631, %v2050_v47  }
 0x362   : > { %1031 = vperm.xlu2 %1632, %v2053_v48  }
 0x364   : > { %v875_v52 = vpop.permute.xlu1 %874  ;;  %v873_v53 = vpop.permute.xlu0 %872 }
 0x365   : > { %v914_v56 = vadd.f32 %v873_v53, %v834_v50  ;;  %v915_v63 = vadd.f32 %v875_v52, %v835_v61  ;;  %v2102_v31 = vpop.permute.xlu2 %964 }
 0x366   : > { %vm1009_vm6 = vcmp.eq.s32.totalorder %v2102_v31, %v1881_v20 }
 0x367   : > { %v2059_v58 = vadd.f32 %v2036_v30, %v914_v56  ;;  %v2073_v7 = vadd.f32 %v2036_v30, %v915_v63 }
 0x369   : > { %1056 = vperm.xlu1 %1631, %v2059_v58  }
 0x36a   : > { %1046 = vperm.xlu2 %1632, %v2062_v59  }
 0x36c   : > { %v881_v0 = vpop.permute.xlu1 %880  ;;  %v879_v1 = vpop.permute.xlu0 %878 }
 0x36d   : > { %v918_v3 = vadd.f32 %v881_v0, %v838_v62  ;;  %v917_v11 = vadd.f32 %v879_v1, %v837_v9  ;;  %v2104_v32 = vpop.permute.xlu2 %973 }
 0x36e   : > { %vm1012_vm2 = vcmp.eq.s32.totalorder %v2104_v32, %v1881_v20 }
 0x36f   : > { %v2070_v6 = vadd.f32 %v2036_v30, %v918_v3  ;;  %v2085_v19 = vadd.f32 %v2036_v30, %v917_v11 }
 0x371   : > { %1076 = vperm.xlu0 %1633, %v2070_v6   ;;  %1066 = vperm.xlu1 %1631, %v2067_v2  }
 0x372   : > { %1061 = vperm.xlu2 %1632, %v2073_v7  }
 0x374   : > { %v885_v12 = vpop.permute.xlu0 %884  ;;  %v887_v16 = vpop.permute.xlu1 %886 }
 0x375   : > { %v920_v14 = vadd.f32 %v885_v12, %v840_v10  ;;  %v921_v22 = vadd.f32 %v887_v16, %v841_v15  ;;  %v2106_v33 = vpop.permute.xlu2 %979 }
 0x376   : > { %vm1014_vm7 = vcmp.eq.s32.totalorder %v2106_v33, %v1881_v20 }
 0x377   : > { %v2082_v18 = vadd.f32 %v2036_v30, %v920_v14  ;;  %v2091_v26 = vadd.f32 %v2036_v30, %v921_v22 }
 0x379   : > { %1081 = vperm.xlu1 %1631, %v2079_v13   ;;  %1086 = vperm.xlu0 %1633, %v2082_v18  }
 0x37a   : > { %1071 = vperm.xlu2 %1632, %v2085_v19  }
 0x37c   : > { %v891_v25 = vpop.permute.xlu0 %890  ;;  %v2108_v34 = vpop.permute.xlu1 %961 }
 0x37d   : > { %v923_v27 = vadd.f32 %v891_v25, %v843_v24  ;;  %v2112_v36 = vpop.permute.xlu2 %991  ;;  %vm1008_vm3 = vcmp.eq.s32.totalorder %v2108_v34, %v1881_v20 }
 0x37e   : > { %vm1018_vm10 = vcmp.eq.s32.totalorder %v2112_v36, %v1881_v20 }
 0x37f   : > { %v2097_v29 = vadd.f32 %v2036_v30, %v923_v27 }
 0x381   : > { %1091 = vperm.xlu1 %1631, %v2091_v26   ;;  %1101 = vperm.xlu0 %1633, %v2097_v29  }
 0x382   : > { %1096 = vperm.xlu2 %1632, %v2094_v28  }
 0x384   : > { %v2110_v35 = vpop.permute.xlu0 %967  ;;  %v2114_v30 = vpop.permute.xlu1 %970 }
 0x385   : > { %v2118_v40 = vpop.permute.xlu2 %997  ;;  %vm1011_vm8 = vcmp.eq.s32.totalorder %v2114_v30, %v1881_v20  ;;  %vm1010_vm9 = vcmp.eq.s32.totalorder %v2110_v35, %v1881_v20 }
 0x386   : > { %vm1020_vm12 = vcmp.eq.s32.totalorder %v2118_v40, %v1881_v20 }
 0x38c   : > { %v2116_v39 = vpop.permute.xlu0 %982  ;;  %v2120_v41 = vpop.permute.xlu1 %976 }
 0x38d   : > { %v2124_v43 = vpop.permute.xlu2 %1006  ;;  %vm2387_vm5 = vcmp.eq.s32.totalorder %v2120_v41, %v1881_v20  ;;  %vm1015_vm11 = vcmp.eq.s32.totalorder %v2116_v39, %v1881_v20 }
 0x38e   : > { %vm1023_vm1 = vcmp.eq.s32.totalorder %v2124_v43, %v1881_v20 }
 0x394   : > { %v2122_v42 = vpop.permute.xlu0 %985  ;;  %v2126_v45 = vpop.permute.xlu1 %988 }
 0x395   : > { %vm1017_vm13 = vcmp.eq.s32.totalorder %v2126_v45, %v1881_v20  ;;  %vm1016_vm14 = vcmp.eq.s32.totalorder %v2122_v42, %v1881_v20 }
 0x39c   : > { %v2128_v49 = vpop.permute.xlu0 %994  ;;  %v2130_v50 = vpop.permute.xlu1 %1003 }
 0x39d   : > { %vm1019_vm15 = vcmp.eq.s32.totalorder %v2128_v49, %v1881_v20  ;;  %vm1022_vm0 = vcmp.eq.s32.totalorder %v2130_v50, %v1881_v20 }
 0x3a4   : > { %v2134_v52 = vpop.permute.xlu0 %1000 }
 0x3bc   : > { %v1032_v46 = vpop.permute.xlu2 %1031 }
 0x3bd   : > { %v1105_v11 = vsel %vm1009_vm6, %v1032_v46, -1e+30 }
 0x3be   : > { %v1122_v24 = vsel %vm1120_vm4, %v1105_v11, -inf }
 0x3c4   : > { %v1047_v51 = vpop.permute.xlu2 %1046 }
 0x3c5   : > { %v1108_v53 = vsel %vm1012_vm2, %v1047_v51, -1e+30 }
 0x3c6   : > { %v1125_v57 = vsel %vm1120_vm4, %v1108_v53, -inf }
 0x3cb   : > { %v1027_v55 = vpop.permute.xlu1 %1026  ;;  %v1037_v62 = vpop.permute.xlu0 %1036 }
 0x3cc   : > { %v1104_v56 = vsel %vm1008_vm3, %v1027_v55, -1e+30  ;;  %v1062_v0 = vpop.permute.xlu2 %1061  ;;  %v1106_v12 = vsel %vm1010_vm9, %v1037_v62, -1e+30 }
 0x3cd   : > { %v1121_v60 = vsel %vm1120_vm4, %v1104_v56, -inf  ;;  %v1111_v22 = vsel %vm1015_vm11, %v1062_v0, -1e+30  ;;  %v1123_v25 = vsel %vm1120_vm4, %v1106_v12, -inf }
 0x3ce   : > { %v1126_v61 = vmax.f32 %v1121_v60, %v1125_v57 }
 0x3d3   : > { %v1042_v63 = vpop.permute.xlu1 %1041  ;;  %v1052_v1 = vpop.permute.xlu0 %1051 }
 0x3d4   : > { %v1072_v8 = vpop.permute.xlu2 %1071  ;;  %v1109_v9 = vsel %vm2387_vm5, %v1052_v1, -1e+30  ;;  %v1107_v16 = vsel %vm1011_vm8, %v1042_v63, -1e+30  ;;  %v1131_v63 = vsel %vm1120_vm4, %v1111_v22, -inf  ;;  %vm1021_vm5 = vcmp.eq.s32.totalorder %v2134_v52, %v1881_v20 }
 0x3d5   : > { %v1127_v17 = vsel %vm1120_vm4, %v1109_v9, -inf  ;;  %v1124_v51 = vsel %vm1120_vm4, %v1107_v16, -inf  ;;  %v1113_v53 = vsel %vm1017_vm13, %v1072_v8, -1e+30 }
 0x3d6   : > { %v1128_v55 = vmax.f32 %v1122_v24, %v1127_v17 }
 0x3db   : > { %v1057_v3 = vpop.permute.xlu1 %1056 }
 0x3dc   : > { %v1110_v10 = vsel %vm1014_vm7, %v1057_v3, -1e+30  ;;  %v1097_v56 = vpop.permute.xlu2 %1096  ;;  %v1132_v3 = vmax.f32 %v1124_v51, %v1131_v63 }
 0x3dd   : > { %v1129_v23 = vsel %vm1120_vm4, %v1110_v10, -inf }
 0x3de   : > { %v1130_v60 = vmax.f32 %v1123_v25, %v1129_v23 }
 0x3e3   : > { %v1067_v4 = vpop.permute.xlu1 %1066  ;;  %v1077_v5 = vpop.permute.xlu0 %1076 }
 0x3e4   : > { %v1114_v21 = vsel %vm1018_vm10, %v1077_v5, -1e+30  ;;  %v1112_v27 = vsel %vm1016_vm14, %v1067_v4, -1e+30  ;;  %v1135_v4 = vsel %vm1120_vm4, %v1113_v53, -inf }
 0x3e5   : > { %v1137_v57 = vsel %vm1120_vm4, %v1114_v21, -inf  ;;  %v1133_v0 = vsel %vm1120_vm4, %v1112_v27, -inf  ;;  %v1118_v5 = vsel %vm1022_vm0, %v1097_v56, -1e+30  ;;  %v1136_v11 = vmax.f32 %v1128_v55, %v1135_v4 }
 0x3e6   : > { %v1138_v8 = vmax.f32 %v1130_v60, %v1137_v57  ;;  %v1145_v21 = vsel %vm1120_vm4, %v1118_v5, -inf }
 0x3e8   : > { %v1146_v24 = vmax.f32 %v1138_v8, %v1145_v21 }
 0x3eb   : > { %v1082_v14 = vpop.permute.xlu1 %1081  ;;  %v1087_v15 = vpop.permute.xlu0 %1086 }
 0x3ec   : > { %v1115_v46 = vsel %vm1019_vm15, %v1082_v14, -1e+30  ;;  %v1116_v62 = vsel %vm1020_vm12, %v1087_v15, -1e+30  ;;  %v1134_v14 = vmax.f32 %v1126_v61, %v1133_v0 }
 0x3ed   : > { %v1139_v1 = vsel %vm1120_vm4, %v1115_v46, -inf  ;;  %v1141_v9 = vsel %vm1120_vm4, %v1116_v62, -inf }
 0x3ee   : > { %v1140_v15 = vmax.f32 %v1132_v3, %v1139_v1  ;;  %v1142_v25 = vmax.f32 %v1134_v14, %v1141_v9 }
 0x3f3   : > { %v1092_v10 = vpop.permute.xlu1 %1091  ;;  %v1102_v12 = vpop.permute.xlu0 %1101 }
 0x3f4   : > { %v1117_v16 = vsel %vm1021_vm5, %v1092_v10, -1e+30  ;;  %v1119_v17 = vsel %vm1023_vm1, %v1102_v12, -1e+30 }
 0x3f5   : > { %v1143_v22 = vsel %vm1120_vm4, %v1117_v16, -inf  ;;  %v1147_v23 = vsel %vm1120_vm4, %v1119_v17, -inf }
 0x3f6   : > { %v1144_v27 = vmax.f32 %v1136_v11, %v1143_v22  ;;  %v1148_v46 = vmax.f32 %v1140_v15, %v1147_v23 }
 0x3f8   : > { %v1149_v61 = vmax.f32 %v1142_v25, %v1144_v27  ;;  %v1150_v51 = vmax.f32 %v1146_v24, %v1148_v46 }
 0x3fa   : > { %v1151_v53 = vmax.f32 %v1149_v61, %v1150_v51 }
 0x3fc   : > { %v1152_v55 = vrot.slane %v1151_v53, 4 }
 0x3fe   : > { %v1153_v56 = vmax.f32 %v1151_v53, %v1152_v55 }
 0x400   : > { %v1154_v57 = vrot.slane %v1153_v56, 2 }
 0x402   : > { %v1155_v60 = vmax.f32 %v1153_v56, %v1154_v57 }
 0x404   : > { %v1156_v62 = vrot.slane %v1155_v60, 1 }
 0x406   : > { %v1157_v63 = vmax.f32 %v1155_v60, %v1156_v62 }
 0x408   : > { %v1173_v0 = vsel %vm1023_vm1, %v1157_v63, 0.0  ;;  %v1172_v1 = vsel %vm1022_vm0, %v1157_v63, 0.0  ;;  %v1171_v3 = vsel %vm1021_vm5, %v1157_v63, 0.0  ;;  %v1161_v43 = vsel %vm1011_vm8, %v1157_v63, 0.0 }
 0x409   : > { %v1219_v4 = vsel %vm1120_vm4, %v1173_v0, 0.0  ;;  %v1216_v5 = vsel %vm1120_vm4, %v1172_v1, 0.0  ;;  %v1213_v8 = vsel %vm1120_vm4, %v1171_v3, 0.0  ;;  %v1170_v50 = vsel %vm1020_vm12, %v1157_v63, 0.0 }
 0x40a   : > { %1220 = vadd.xlane.f32.xlu1 %v1219_v4  ;;  %1217 = vadd.xlane.f32.xlu2 %v1216_v5  ;;  %v1169_v52 = vsel %vm1019_vm15, %v1157_v63, 0.0  ;;  %v1162_v9 = vsel %vm1012_vm2, %v1157_v63, 0.0  ;;  %v1160_v10 = vsel %vm1010_vm9, %v1157_v63, 0.0  ;;  %v1158_v30 = vsel %vm1008_vm3, %v1157_v63, 0.0 }
 0x40b   : > { %1214 = vadd.xlane.f32.xlu0 %v1213_v8  ;;  %v1159_v40 = vsel %vm1009_vm6, %v1157_v63, 0.0  ;;  %v1167_v49 = vsel %vm1017_vm13, %v1157_v63, 0.0  ;;  %v1210_v32 = vsel %vm1120_vm4, %v1170_v50, 0.0  ;;  %v1207_v12 = vsel %vm1120_vm4, %v1169_v52, 0.0 }
 0x40c   : > { %v1177_v11 = vsel %vm1120_vm4, %v1159_v40, 0.0  ;;  %v1201_v35 = vsel %vm1120_vm4, %v1167_v49, 0.0  ;;  %v1168_v31 = vsel %vm1018_vm10, %v1157_v63, 0.0  ;;  %v1166_v34 = vsel %vm1016_vm14, %v1157_v63, 0.0 }
 0x40d   : > { %v1164_v45 = vsel %vm1014_vm7, %v1157_v63, 0.0  ;;  %v1204_v14 = vsel %vm1120_vm4, %v1168_v31, 0.0  ;;  %v1198_v15 = vsel %vm1120_vm4, %v1166_v34, 0.0  ;;  %v1165_v36 = vsel %vm1015_vm11, %v1157_v63, 0.0 }
 0x40e   : > { %v1192_v16 = vsel %vm1120_vm4, %v1164_v45, 0.0  ;;  %vm2388_vm2 = vcmp.eq.s32.totalorder %v2120_v41, %v1881_v20  ;;  %v1195_v33 = vsel %vm1120_vm4, %v1165_v36, 0.0  ;;  %v1183_v21 = vsel %vm1120_vm4, %v1161_v43, 0.0 }
 0x40f   : > { %v1163_v42 = vsel %vm2388_vm2, %v1157_v63, 0.0  ;;  %v1186_v22 = vsel %vm1120_vm4, %v1162_v9, 0.0  ;;  %v1180_v23 = vsel %vm1120_vm4, %v1160_v10, 0.0  ;;  %v1174_v39 = vsel %vm1120_vm4, %v1158_v30, 0.0 }
 0x410   : > { %v1189_v17 = vsel %vm1120_vm4, %v1163_v42, 0.0 }
 0x412   : > { %1211 = vadd.xlane.f32.xlu2 %v1210_v32  ;;  %1208 = vadd.xlane.f32.xlu1 %v1207_v12 }
 0x413   : > { %1202 = vadd.xlane.f32.xlu0 %v1201_v35 }
 0x41a   : > { %1205 = vadd.xlane.f32.xlu2 %v1204_v14  ;;  %1199 = vadd.xlane.f32.xlu1 %v1198_v15 }
 0x41b   : > { %1193 = vadd.xlane.f32.xlu0 %v1192_v16 }
 0x422   : > { %1196 = vadd.xlane.f32.xlu2 %v1195_v33  ;;  %1190 = vadd.xlane.f32.xlu1 %v1189_v17 }
 0x423   : > { %1184 = vadd.xlane.f32.xlu0 %v1183_v21 }
 0x42a   : > { %1187 = vadd.xlane.f32.xlu2 %v1186_v22  ;;  %1181 = vadd.xlane.f32.xlu1 %v1180_v23 }
 0x42b   : > { %1175 = vadd.xlane.f32.xlu0 %v1174_v39 }
 0x432   : > { %1178 = vadd.xlane.f32.xlu2 %v1177_v11 }
 0x47d   : > { %v1221_v20 = vpop.xlane.xlu1 %1220  ;;  %v1218_v41 = vpop.xlane.xlu2 %1217 }
 0x47e   : > { %v1237_v24 = vsub.f32 %v2097_v29, %v1221_v20  ;;  %v1236_v25 = vsub.f32 %v2094_v28, %v1218_v41  ;;  %v1215_v27 = vpop.xlane.xlu0 %1214 }
 0x47f   : > { %v1235_v46 = vsub.f32 %v2091_v26, %v1215_v27  ;;  %v811_v27 = vld [vmem:[%s2379_s0 + $0x78] sm:$0xff] }
 0x480   : > { %v1268_v61 = vmul.f32 1.442695, %v1237_v24  ;;  %v1266_v51 = vmul.f32 1.442695, %v1236_v25 }
 0x481   : > { %v1264_v53 = vmul.f32 1.442695, %v1235_v46  ;;  %v810_v46 = vld [vmem:[%s2379_s0 + $0x70] sm:$0xff] }
 0x482   : > { %1636 = vpow2.f32 %v1268_v61 }
 0x483   : > { %1638 = vpow2.f32 %v1266_v51 }
 0x484   : > { %1640 = vpow2.f32 %v1264_v53 }
 0x485   : > { %v1212_v55 = vpop.xlane.xlu2 %1211  ;;  %v1209_v56 = vpop.xlane.xlu1 %1208 }
 0x486   : > { %v1234_v57 = vsub.f32 %v2082_v18, %v1212_v55  ;;  %v1233_v60 = vsub.f32 %v2079_v13, %v1209_v56  ;;  %v1203_v62 = vpop.xlane.xlu0 %1202  ;;  %v809_v55 = vld [vmem:[%s2379_s0 + $0x68] sm:$0xff] }
 0x487   : > { %v1231_v1 = vsub.f32 %v2085_v19, %v1203_v62  ;;  %v808_v62 = vld [vmem:[%s2379_s0 + $0x60] sm:$0xff] }
 0x488   : > { %v1637_v63 = vpop.eup %1636  ;;  %v1262_v29 = vmul.f32 1.442695, %v1234_v57  ;;  %v1260_v0 = vmul.f32 1.442695, %v1233_v60 }
 0x489   : > { %v1639_v28 = vpop.eup %1638  ;;  %1391 = vmatpush.msra.mxu1 %v1637_v63  ;;  %1352 = vperm.xlu1 %1631, %v1637_v63   ;;  %v1256_v3 = vmul.f32 1.442695, %v1231_v1 }
 0x48a   : > { %v1641_v26 = vpop.eup %1640  ;;  %1642 = vpow2.f32 %v1262_v29  ;;  %1347 = vperm.xlu2 %1632, %v1639_v28   ;;  %v807_v29 = vld [vmem:[%s2379_s0 + $0x58] sm:$0xff] }
 0x48b   : > { %1644 = vpow2.f32 %v1260_v0  ;;  %1342 = vperm.xlu0 %1633, %v1641_v26   ;;  %1392 = vmatpush.msra.mxu1 %v1639_v28  ;;  %v806_v28 = vld [vmem:[%s2379_s0 + $0x50] sm:$0xff] }
 0x48c   : > { %1646 = vpow2.f32 %v1256_v3 }
 0x48d   : > { %1393 = vmatpush.msra.mxu1 %v1641_v26  ;;  %v1206_v18 = vpop.xlane.xlu2 %1205  ;;  %v1200_v4 = vpop.xlane.xlu1 %1199 }
 0x48e   : > { %v1232_v13 = vsub.f32 %v2070_v6, %v1206_v18  ;;  %v1230_v5 = vsub.f32 %v2067_v2, %v1200_v4  ;;  %v1194_v8 = vpop.xlane.xlu0 %1193  ;;  %v805_v4 = vld [vmem:[%s2379_s0 + $0x48] sm:$0xff] }
 0x48f   : > { %v1228_v9 = vsub.f32 %v2059_v58, %v1194_v8 }
 0x490   : > { %v1643_v43 = vpop.eup %1642  ;;  %v1258_v50 = vmul.f32 1.442695, %v1232_v13  ;;  %v1254_v19 = vmul.f32 1.442695, %v1230_v5  ;;  %v804_v5 = vld [vmem:[%s2379_s0 + $0x40] sm:$0xff] }
 0x491   : > { %v1645_v52 = vpop.eup %1644  ;;  %1394 = vmatpush.msra.mxu1 %v1643_v43  ;;  %1337 = vperm.xlu1 %1631, %v1643_v43   ;;  %v1250_v10 = vmul.f32 1.442695, %v1228_v9  ;;  %v803_v43 = vld [vmem:[%s2379_s0 + $0x38] sm:$0xff]  ;;  %v802_v9 = vld [vmem:[%s2379_s0 + $0x30] sm:$0xff] }
 0x492   : > { %1648 = vpow2.f32 %v1258_v50  ;;  %v1647_v11 = vpop.eup %1646 }
 0x493   : > { %1650 = vpow2.f32 %v1254_v19  ;;  %1332 = vperm.xlu0 %1633, %v1645_v52   ;;  %1395 = vmatpush.msra.mxu1 %v1645_v52 }
 0x494   : > { %1652 = vpow2.f32 %v1250_v10 }
 0x495   : > { %v1197_v30 = vpop.xlane.xlu2 %1196  ;;  %v1191_v40 = vpop.xlane.xlu1 %1190 }
 0x496   : > { %v1229_v6 = vsub.f32 %v2073_v7, %v1197_v30  ;;  %v1227_v2 = vsub.f32 %v2047_v44, %v1191_v40  ;;  %v1185_v49 = vpop.xlane.xlu0 %1184  ;;  %v801_v40 = vld [vmem:[%s2379_s0 + $0x28] sm:$0xff] }
 0x497   : > { %v1225_v58 = vsub.f32 %v2050_v47, %v1185_v49 }
 0x498   : > { %v1649_v32 = vpop.eup %1648  ;;  %v1252_v12 = vmul.f32 1.442695, %v1229_v6  ;;  %v1248_v35 = vmul.f32 1.442695, %v1227_v2  ;;  %v800_v2 = vld [vmem:[%s2379_s0 + $0x20] sm:$0xff] }
 0x499   : > { %v1651_v31 = vpop.eup %1650  ;;  %1396 = vmatpush.msra.mxu1 %v1649_v32  ;;  %1322 = vperm.xlu1 %1631, %v1647_v11   ;;  %v1244_v34 = vmul.f32 1.442695, %v1225_v58 }
 0x49a   : > { %1654 = vpow2.f32 %v1252_v12  ;;  %1327 = vperm.xlu2 %1632, %v1649_v32   ;;  %v1653_v16 = vpop.eup %1652  ;;  %v799_v12 = vld [vmem:[%s2379_s0 + $0x18] sm:$0xff] }
 0x49b   : > { %1656 = vpow2.f32 %v1248_v35  ;;  %1317 = vperm.xlu0 %1633, %v1651_v31   ;;  %1397 = vmatpush.msra.mxu1 %v1647_v11 }
 0x49c   : > { %1658 = vpow2.f32 %v1244_v34 }
 0x49d   : > { %1398 = vmatpush.msra.mxu1 %v1651_v31  ;;  %v1188_v7 = vpop.xlane.xlu2 %1187  ;;  %v1182_v44 = vpop.xlane.xlu1 %1181  ;;  %v798_v31 = vld [vmem:[%s2379_s0 + $0x10] sm:$0xff] }
 0x49e   : > { %v1226_v45 = vsub.f32 %v2062_v59, %v1188_v7  ;;  %v1224_v14 = vsub.f32 %v2039_v37, %v1182_v44  ;;  %v1176_v15 = vpop.xlane.xlu0 %1175  ;;  %v797_v7 = vld [vmem:[%s2379_s0 + $0x8] sm:$0xff] }
 0x49f   : > { %v1222_v17 = vsub.f32 %v2042_v38, %v1176_v15  ;;  %v2313_v38 = vld [vmem:[%s2384_s5] ss:$0 sm:$0xff] }
 0x4a0   : > { %v1655_v36 = vpop.eup %1654  ;;  %v1246_v42 = vmul.f32 1.442695, %v1226_v45  ;;  %v1242_v47 = vmul.f32 1.442695, %v1224_v14  ;;  %vm1272_vm3 = vcmp.eq.s32.totalorder %v1916_v54, %v2313_v38  ;;  %v796_v15 = vld [vmem:[%s2379_s0] sm:$0xff] }
 0x4a1   : > { %v1657_v33 = vpop.eup %1656  ;;  %1399 = vmatpush.msra.mxu1 %v1655_v36  ;;  %1307 = vperm.xlu1 %1631, %v1653_v16   ;;  %v1238_v21 = vmul.f32 1.442695, %v1222_v17 }
 0x4a2   : > { %1660 = vpow2.f32 %v1246_v42  ;;  %1312 = vperm.xlu2 %1632, %v1655_v36   ;;  %v1659_v22 = vpop.eup %1658 }
 0x4a3   : > { %1662 = vpow2.f32 %v1242_v47  ;;  %1302 = vperm.xlu0 %1633, %v1657_v33   ;;  %1400 = vmatpush.msra.mxu1 %v1653_v16 }
 0x4a4   : > { %1664 = vpow2.f32 %v1238_v21 }
 0x4a5   : > { %1401 = vmatpush.msra.mxu1 %v1657_v33  ;;  %v1179_v59 = vpop.xlane.xlu2 %1178 }
 0x4a6   : > { %v1223_v37 = vsub.f32 %v2053_v48, %v1179_v59  ;;  %v1683_v48 = vmov 1.0  }
 0x4a8   : > { %v1661_v23 = vpop.eup %1660  ;;  %v1240_v39 = vmul.f32 1.442695, %v1223_v37 }
 0x4a9   : > { %v1663_v20 = vpop.eup %1662  ;;  %1402 = vmatpush.msra.mxu1 %v1661_v23  ;;  %1292 = vperm.xlu1 %1631, %v1659_v22  }
 0x4aa   : > { %1666 = vpow2.f32 %v1240_v39  ;;  %1297 = vperm.xlu2 %1632, %v1661_v23   ;;  %v1665_v41 = vpop.eup %1664 }
 0x4ab   : > { %1287 = vperm.xlu0 %1633, %v1663_v20   ;;  %1403 = vmatpush.msra.mxu1 %v1659_v22 }
 0x4ad   : > { %1404 = vmatpush.msra.mxu1 %v1663_v20 }
 0x4b0   : > { %v1667_v24 = vpop.eup %1666 }
 0x4b1   : > { %1405 = vmatpush.msra.mxu1 %v1667_v24  ;;  %1277 = vperm.xlu1 %1631, %v1665_v41  }
 0x4b2   : > { %1282 = vperm.xlu2 %1632, %v1667_v24  }
 0x4b3   : > { %1406 = vmatpush.msra.mxu1 %v1665_v41 }
 0x4b4   : > { %1530 = vmatmul.msk.f32.vlgmr.msra.gmra.mxu1 %vm1272_vm3, %v1683_v48 }
 0x4e4   : > { %v1348_v25 = vpop.permute.xlu2 %1347 }
 0x4e5   : > { %v1369_v56 = vmul.f32 %v1348_v25, %v810_v46 }
 0x4f4   : > { %v1328_v57 = vpop.permute.xlu2 %1327 }
 0x4f5   : > { %v1365_v3 = vmul.f32 %v1328_v57, %v806_v28 }
 0x4fb   : > { %v1353_v61 = vpop.permute.xlu1 %1352 }
 0x4fc   : > { %v1370_v51 = vmul.f32 %v1353_v61, %v811_v27  ;;  %v1313_v18 = vpop.permute.xlu2 %1312 }
 0x4fd   : > { %v1343_v53 = vpop.permute.xlu0 %1342  ;;  %v1362_v52 = vmul.f32 %v1313_v18, %v803_v43 }
 0x4fe   : > { %1371 = vmatpush.msra.mxu0 %v1370_v51  ;;  %v1368_v60 = vmul.f32 %v1343_v53, %v809_v55 }
 0x500   : > { %1372 = vmatpush.msra.mxu0 %v1369_v56 }
 0x502   : > { %1373 = vmatpush.msra.mxu0 %v1368_v60 }
 0x503   : > { %v1338_v63 = vpop.permute.xlu1 %1337 }
 0x504   : > { %v1367_v0 = vmul.f32 %v1338_v63, %v808_v62  ;;  %v1298_v10 = vpop.permute.xlu2 %1297 }
 0x505   : > { %v1333_v1 = vpop.permute.xlu0 %1332  ;;  %v1359_v32 = vmul.f32 %v1298_v10, %v800_v2 }
 0x506   : > { %v1366_v26 = vmul.f32 %v1333_v1, %v807_v29  ;;  %1374 = vmatpush.msra.mxu0 %v1367_v0 }
 0x508   : > { %1375 = vmatpush.msra.mxu0 %v1366_v26 }
 0x50a   : > { %1376 = vmatpush.msra.mxu0 %v1365_v3 }
 0x50b   : > { %v1323_v13 = vpop.permute.xlu1 %1322 }
 0x50c   : > { %v1364_v8 = vmul.f32 %v1323_v13, %v805_v4  ;;  %v1283_v34 = vpop.permute.xlu2 %1282 }
 0x50d   : > { %v1318_v50 = vpop.permute.xlu0 %1317  ;;  %v1356_v14 = vmul.f32 %v1283_v34, %v797_v7 }
 0x50e   : > { %v1363_v19 = vmul.f32 %v1318_v50, %v804_v5  ;;  %1377 = vmatpush.msra.mxu0 %v1364_v8 }
 0x510   : > { %1378 = vmatpush.msra.mxu0 %v1363_v19 }
 0x512   : > { %1379 = vmatpush.msra.mxu0 %v1362_v52 }
 0x513   : > { %v1308_v30 = vpop.permute.xlu1 %1307 }
 0x514   : > { %v1361_v6 = vmul.f32 %v1308_v30, %v802_v9 }
 0x515   : > { %v1303_v49 = vpop.permute.xlu0 %1302 }
 0x516   : > { %v1360_v11 = vmul.f32 %v1303_v49, %v801_v40  ;;  %1380 = vmatpush.msra.mxu0 %v1361_v6 }
 0x518   : > { %1381 = vmatpush.msra.mxu0 %v1360_v11 }
 0x51a   : > { %1382 = vmatpush.msra.mxu0 %v1359_v32 }
 0x51b   : > { %v1293_v35 = vpop.permute.xlu1 %1292 }
 0x51c   : > { %v1358_v58 = vmul.f32 %v1293_v35, %v799_v12 }
 0x51d   : > { %v1288_v44 = vpop.permute.xlu0 %1287 }
 0x51e   : > { %v1357_v45 = vmul.f32 %v1288_v44, %v798_v31  ;;  %1383 = vmatpush.msra.mxu0 %v1358_v58 }
 0x520   : > { %1384 = vmatpush.msra.mxu0 %v1357_v45 }
 0x522   : > { %1385 = vmatpush.msra.mxu0 %v1356_v14 }
 0x523   : > { %v1278_v16 = vpop.permute.xlu1 %1277 }
 0x524   : > { %v1355_v36 = vmul.f32 %v1278_v16, %v796_v15 }
 0x526   : > { %1386 = vmatpush.msra.mxu0 %v1355_v36 }
 0x527   : > { %1529 = vmatmul.msk.f32.vlgmr.msra.gmra.mxu0 %vm1272_vm3, %v1683_v48 }
 0x531   : > { %v1408_v42 = vpop.f32.mrf.mxu1 }
 0x532   : > { %v1409_v47 = vadd.f32 1e-16, %v1408_v42 }
 0x534   : > { %1668 = vrcp.f32 %v1409_v47 }
 0x53a   : > { %v1669_v33 = vpop.eup %1668 }
 0x53b   : > { %1414 = vperm.xlu0 %1633, %v1669_v33  }
 0x5a4   : > { %v1388_v17 = vpop.f32.mrf.mxu0 }
 0x5ad   : > { %v1415_v21 = vpop.permute.xlu0 %1414 }
 0x5ae   : > { %v1417_v59 = vmul.f32 %v1415_v21, %v1388_v17 }
 0x5b0   : > { %1418 = vst [vmem:[%s2386_s7] sm:$0xff] %v1417_v59 }
 0x5b1 PF: > { %s19_s26 = sadd.s32 1, %s1676_s26  }
 0x5b2   : > { %p16_p7 = scmp.ge.s32.totalorder %s19_s26, 4  }
 0x5b4   :  { %18 = sbr.rel (!%p16_p7) target bundleno = 3 (0x3), region = 85 }

</bundles_post_ra>
